<compile_context>
chip_gen: v5e
topology: v5e:2x2
jax: 0.10.0
libtpu: 0.0.40
codegen_flags: <defaults>
</compile_context>

<pallas_src>
import math

import jax
import jax.numpy as jnp
from jax.experimental import pallas as pl
from jax.experimental.pallas import tpu as pltpu

_VMEM_LIMIT = 32 * 1024 * 1024  # safe default on v5e/v6e/v7x


# ----------------------------------------------------------------------------
# in-kernel helpers (operate on f32 matmul results)
# ----------------------------------------------------------------------------
def _shift_down(t):
    """row r -> row r+1, row 0 <- 0."""
    return jnp.concatenate([jnp.zeros((1, t.shape[1]), t.dtype), t[:-1, :]], axis=0)


def _shift_up(t):
    """row r -> row r-1, last row <- 0."""
    return jnp.concatenate([t[1:, :], jnp.zeros((1, t.shape[1]), t.dtype)], axis=0)


def _down_layer(phases, w_ref, bias):
    """Conv1d(k=3, s=2, p=1) + ReLU in polyphase form.

    Input: n phase tiles P_i of shape (L3, Cin) with x[n*p + i] = P_i[p].
    Output: n/2 phase tiles Y_j of shape (L3, Cout) with y[(n/2)*q + j] = Y_j[q],
      where y[l] = x[2l-1] @ W0 + x[2l] @ W1 + x[2l+1] @ W2 + b   (x[-1] = 0).
    """
    n = len(phases)
    w0, w1, w2 = w_ref[0], w_ref[1], w_ref[2]
    # W0 term of output phase 0 comes from the LAST input phase, shifted one row.
    first_w0 = _shift_down(
        jnp.dot(phases[n - 1], w0, preferred_element_type=jnp.float32))
    out = []
    for j in range(n // 2):
        acc = first_w0 if j == 0 else jnp.dot(
            phases[2 * j - 1], w0, preferred_element_type=jnp.float32)
        acc = acc + jnp.dot(phases[2 * j], w1, preferred_element_type=jnp.float32)
        acc = acc + jnp.dot(phases[2 * j + 1], w2, preferred_element_type=jnp.float32)
        acc = jnp.maximum(acc + bias, 0.0)
        out.append(acc.astype(jnp.bfloat16))
    return out


def _up_layer(phases, w_ref, bias, relu, out_dtype):
    """ConvTranspose1d(k=3, s=2, p=1, output_padding=1) in polyphase form.

    Input: n phase tiles P_i (L3, Cin) with x[n*p + i] = P_i[p].
    Output: 2n phase tiles Q_j (L3, Cout):
      out[2m]   = x[m] @ W1 + b
      out[2m+1] = x[m] @ W2 + x[m+1] @ W0 + b      (x[Lin] = 0)
    """
    n = len(phases)
    w0, w1, w2 = w_ref[0], w_ref[1], w_ref[2]
    t_w0 = [jnp.dot(p, w0, preferred_element_type=jnp.float32) for p in phases]
    wrap_w0 = _shift_up(t_w0[0])                  # x[n*p + n] = P_0[p + 1]
    out = []
    for i in range(n):
        q_even = jnp.dot(phases[i], w1, preferred_element_type=jnp.float32) + bias
        w0_term = t_w0[i + 1] if i < n - 1 else wrap_w0
        q_odd = (jnp.dot(phases[i], w2, preferred_element_type=jnp.float32)
                 + w0_term + bias)
        if relu:
            q_even = jnp.maximum(q_even, 0.0)
            q_odd = jnp.maximum(q_odd, 0.0)
        out.append(q_even.astype(out_dtype))
        out.append(q_odd.astype(out_dtype))
    return out


# ----------------------------------------------------------------------------
# Pallas kernels
# ----------------------------------------------------------------------------
def _encoder_kernel(xph_ref, w1_ref, b1_ref, w2_ref, b2_ref, w3_ref, b3_ref, h3_ref):
    """Fused enc_conv1..3 (+ReLU) for one batch element.

    xph_ref: (8, L3, F) bf16 input phases (x[8p+i] = xph[i, p]);
    h3_ref:  (L3, H) bf16 encoder output in natural row order.
    """
    phases = [xph_ref[i] for i in range(8)]
    phases = _down_layer(phases, w1_ref, b1_ref[...])
    phases = _down_layer(phases, w2_ref, b2_ref[...])
    phases = _down_layer(phases, w3_ref, b3_ref[...])
    h3_ref[...] = phases[0]


def _latent_kernel(h_ref, wmu_ref, bmu_ref, wlv_ref, blv_ref, wd_ref, bd_ref,
                   mu_ref, lv_ref, d_ref):
    """fc_mu + fc_logvar + eval-mode reparameterize + dec_fc, batched over B."""
    h = h_ref[...]                                                    # (B, enc_dim) bf16
    mu = jnp.dot(h, wmu_ref[...], preferred_element_type=jnp.float32) + bmu_ref[...]
    lv = jnp.dot(h, wlv_ref[...], preferred_element_type=jnp.float32) + blv_ref[...]
    # TODO(synk): training-mode reparameterize (mu + eps*exp(0.5*logvar)) needs RNG;
    # eval-mode semantics (z = mu) implemented, matching module.eval() forward.
    z = mu
    d = jnp.dot(z.astype(jnp.bfloat16), wd_ref[...],
                preferred_element_type=jnp.float32) + bd_ref[...]
    mu_ref[...] = mu
    lv_ref[...] = lv
    d_ref[...] = d.astype(d_ref.dtype)


def _decoder_kernel(d_ref, w1_ref, b1_ref, w2_ref, b2_ref, w3_ref, b3_ref, o_ref):
    """Fused dec_deconv1..3 for one batch element.

    d_ref: (L3, H) bf16; o_ref: (8, L3, F) f32 with o_ref[j, p] = x_hat[8p + j].
    """
    phases = [d_ref[...]]
    phases = _up_layer(phases, w1_ref, b1_ref[...], relu=True, out_dtype=jnp.bfloat16)
    phases = _up_layer(phases, w2_ref, b2_ref[...], relu=True, out_dtype=jnp.bfloat16)
    phases = _up_layer(phases, w3_ref, b3_ref[...], relu=False, out_dtype=jnp.float32)
    for j in range(8):
        o_ref[j] = phases[j]


# ----------------------------------------------------------------------------
# pallas_call wrappers
# ----------------------------------------------------------------------------
def encoder_convs(x_nlc, p):
    """x: (B, L0, F) -> h3: (B, L3, H) bf16."""
    B, L0, F = x_nlc.shape
    H = p["ec1_w"].shape[2]
    L3 = L0 // 8
    # phase-split: xph[b, i, p, f] = x[b, 8p + i, f]
    xph = (x_nlc.reshape(B, L3, 8, F).transpose(0, 2, 1, 3)).astype(jnp.bfloat16)
    w1 = p["ec1_w"].astype(jnp.bfloat16); b1 = p["ec1_b"].reshape(1, -1)
    w2 = p["ec2_w"].astype(jnp.bfloat16); b2 = p["ec2_b"].reshape(1, -1)
    w3 = p["ec3_w"].astype(jnp.bfloat16); b3 = p["ec3_b"].reshape(1, -1)
    flops = 2 * 3 * B * L3 * (4 * F * H + 2 * H * H + H * H)
    bytes_acc = ((xph.size + w1.size + w2.size + w3.size) * 2
                 + (b1.size + b2.size + b3.size) * 4 + B * L3 * H * 2)
    return pl.pallas_call(
        _encoder_kernel,
        out_shape=jax.ShapeDtypeStruct((B, L3, H), jnp.bfloat16),
        grid=(B,),
        in_specs=[
            pl.BlockSpec((None, 8, L3, F), lambda b: (b, 0, 0, 0)),
            pl.BlockSpec((3, F, H), lambda b: (0, 0, 0)),
            pl.BlockSpec((1, H), lambda b: (0, 0)),
            pl.BlockSpec((3, H, H), lambda b: (0, 0, 0)),
            pl.BlockSpec((1, H), lambda b: (0, 0)),
            pl.BlockSpec((3, H, H), lambda b: (0, 0, 0)),
            pl.BlockSpec((1, H), lambda b: (0, 0)),
        ],
        out_specs=pl.BlockSpec((None, L3, H), lambda b: (b, 0, 0)),
        compiler_params=pltpu.CompilerParams(
            dimension_semantics=("parallel",), vmem_limit_bytes=_VMEM_LIMIT),
        cost_estimate=pl.CostEstimate(flops=int(flops), transcendentals=0,
                                      bytes_accessed=int(bytes_acc)),
    )(xph, w1, b1, w2, b2, w3, b3)


def latent_block(h_flat, p):
    """h_flat: (B, enc_dim) bf16 -> (mu f32, logvar f32, dec_fc-out bf16)."""
    B, K = h_flat.shape
    E = p["fmu_w"].shape[1]
    wmu = p["fmu_w"].astype(jnp.bfloat16); bmu = p["fmu_b"].reshape(1, -1)
    wlv = p["flv_w"].astype(jnp.bfloat16); blv = p["flv_b"].reshape(1, -1)
    wd = p["dfc_w"].astype(jnp.bfloat16);  bd = p["dfc_b"].reshape(1, -1)

    def full(shape):
        return pl.BlockSpec(shape, lambda i, _s=shape: (0,) * len(_s))

    flops = 2 * B * (2 * K * E + E * K)
    bytes_acc = (h_flat.size * 2 + (wmu.size + wlv.size + wd.size) * 2
                 + B * (2 * E * 4 + K * 2))
    mu, logvar, d = pl.pallas_call(
        _latent_kernel,
        out_shape=(jax.ShapeDtypeStruct((B, E), jnp.float32),
                   jax.ShapeDtypeStruct((B, E), jnp.float32),
                   jax.ShapeDtypeStruct((B, K), jnp.bfloat16)),
        grid=(1,),
        in_specs=[full((B, K)), full((K, E)), full((1, E)),
                  full((K, E)), full((1, E)), full((E, K)), full((1, K))],
        out_specs=[full((B, E)), full((B, E)), full((B, K))],
        compiler_params=pltpu.CompilerParams(
            dimension_semantics=("arbitrary",), vmem_limit_bytes=_VMEM_LIMIT),
        cost_estimate=pl.CostEstimate(flops=int(flops), transcendentals=0,
                                      bytes_accessed=int(bytes_acc)),
    )(h_flat, wmu, bmu, wlv, blv, wd, bd)
    return mu, logvar, d


def decoder_convs(d_blh, p):
    """d: (B, L3, H) bf16 -> x_hat NCL (B, F, 8*L3) f32."""
    B, L3, H = d_blh.shape
    F = p["dc3_w"].shape[2]
    w1 = p["dc1_w"].astype(jnp.bfloat16); b1 = p["dc1_b"].reshape(1, -1)
    w2 = p["dc2_w"].astype(jnp.bfloat16); b2 = p["dc2_b"].reshape(1, -1)
    w3 = p["dc3_w"].astype(jnp.bfloat16); b3 = p["dc3_b"].reshape(1, -1)
    flops = 2 * 3 * B * L3 * (H * H + 2 * H * H + 4 * H * F)
    bytes_acc = ((d_blh.size + w1.size + w2.size + w3.size) * 2
                 + (b1.size + b2.size + b3.size) * 4 + B * 8 * L3 * F * 4)
    out = pl.pallas_call(
        _decoder_kernel,
        out_shape=jax.ShapeDtypeStruct((B, 8, L3, F), jnp.float32),
        grid=(B,),
        in_specs=[
            pl.BlockSpec((None, L3, H), lambda b: (b, 0, 0)),
            pl.BlockSpec((3, H, H), lambda b: (0, 0, 0)),
            pl.BlockSpec((1, H), lambda b: (0, 0)),
            pl.BlockSpec((3, H, H), lambda b: (0, 0, 0)),
            pl.BlockSpec((1, H), lambda b: (0, 0)),
            pl.BlockSpec((3, H, F), lambda b: (0, 0, 0)),
            pl.BlockSpec((1, F), lambda b: (0, 0)),
        ],
        out_specs=pl.BlockSpec((None, 8, L3, F), lambda b: (b, 0, 0, 0)),
        compiler_params=pltpu.CompilerParams(
            dimension_semantics=("parallel",), vmem_limit_bytes=_VMEM_LIMIT),
        cost_estimate=pl.CostEstimate(flops=int(flops), transcendentals=0,
                                      bytes_accessed=int(bytes_acc)),
    )(d_blh, w1, b1, w2, b2, w3, b3)
    # interleave phases: out[b, j, p, f] = x_hat[b, 8p + j, f]  ->  NCL (B, F, L0)
    return out.transpose(0, 3, 2, 1).reshape(B, F, 8 * L3)


# ----------------------------------------------------------------------------
# ConvVAE parameters + forward
# ----------------------------------------------------------------------------
def init_params(key, num_steps, num_features, num_hiddens, num_embeddings):
    assert num_steps % 8 == 0, "num_steps must be divisible by 8"
    L3 = num_steps // 8
    enc_dim = L3 * num_hiddens
    Fe, H, E = num_features, num_hiddens, num_embeddings
    ks = jax.random.split(key, 18)

    def u(kk, shape, fan_in):
        bound = 1.0 / math.sqrt(fan_in)
        return jax.random.uniform(kk, shape, jnp.float32, -bound, bound)

    p = {}
    # encoder Conv1d weights, tap-major (k, Cin, Cout): w[t, ci, co] == torch_w[co, ci, t]
    p["ec1_w"] = u(ks[0], (3, Fe, H), Fe * 3); p["ec1_b"] = u(ks[1], (H,), Fe * 3)
    p["ec2_w"] = u(ks[2], (3, H, H), H * 3);   p["ec2_b"] = u(ks[3], (H,), H * 3)
    p["ec3_w"] = u(ks[4], (3, H, H), H * 3);   p["ec3_b"] = u(ks[5], (H,), H * 3)
    # fc_mu / fc_logvar / dec_fc stored (in, out); flatten order is (l, c)-major
    # (equivalent to the torch module up to a fixed permutation of the randomly
    # initialized fc rows/cols, since weights are created here).
    p["fmu_w"] = u(ks[6], (enc_dim, E), enc_dim); p["fmu_b"] = u(ks[7], (E,), enc_dim)
    p["flv_w"] = u(ks[8], (enc_dim, E), enc_dim); p["flv_b"] = u(ks[9], (E,), enc_dim)
    p["dfc_w"] = u(ks[10], (E, enc_dim), E);      p["dfc_b"] = u(ks[11], (enc_dim,), E)
    # decoder ConvTranspose1d weights, tap-major (k, Cin, Cout): w[t,ci,co]==torch_w[ci,co,t]
    p["dc1_w"] = u(ks[12], (3, H, H), H * 3);  p["dc1_b"] = u(ks[13], (H,), H * 3)
    p["dc2_w"] = u(ks[14], (3, H, H), H * 3);  p["dc2_b"] = u(ks[15], (H,), H * 3)
    p["dc3_w"] = u(ks[16], (3, H, Fe), H * 3); p["dc3_b"] = u(ks[17], (Fe,), H * 3)
    return p


def conv_vae_forward(params, x_ncl):
    """x: (B, num_features, num_steps) -> (x_hat, mu, logvar). Eval-mode reparameterize."""
    B, _, L0 = x_ncl.shape
    assert L0 % 8 == 0, "num_steps must be divisible by 8"
    H = params["dc1_w"].shape[1]
    L3 = L0 // 8
    x_nlc = jnp.transpose(x_ncl, (0, 2, 1))          # single NCL -> NLC transpose at entry
    h3 = encoder_convs(x_nlc, params)                # (B, L3, H) bf16
    h_flat = h3.reshape(B, L3 * H)                   # (l, c)-major flatten (matches fc rows)
    mu, logvar, d = latent_block(h_flat, params)
    d_blh = d.reshape(B, L3, H)                      # dec_fc output, (l, c)-major columns
    x_hat = decoder_convs(d_blh, params)             # (B, F, L0) NCL
    return x_hat, mu, logvar


# ----------------------------------------------------------------------------
# pure-JAX f32 reference (for correctness checking only)
# ----------------------------------------------------------------------------
def _ref_conv_s2(x, w_taps, b):
    B, L, _ = x.shape
    Lout = L // 2
    xp = jnp.pad(x, ((0, 0), (1, 1), (0, 0)))
    y = b
    for t in range(3):
        y = y + jnp.einsum("blc,cd->bld", xp[:, t:t + 2 * Lout:2, :], w_taps[t])
    return y


def _ref_deconv_s2(x, w_taps, b):
    # ConvTranspose1d(k=3,s=2,p=1,op=1) == dilate by 2, pad (1,2), correlate flipped taps
    B, L, Cin = x.shape
    up = jnp.zeros((B, 2 * L - 1, Cin), x.dtype).at[:, 0::2, :].set(x)
    up = jnp.pad(up, ((0, 0), (1, 2), (0, 0)))
    y = b
    for t in range(3):
        y = y + jnp.einsum("blc,cd->bld", up[:, t:t + 2 * L, :], w_taps[2 - t])
    return y


def _ref_forward(params, x_ncl):
    B = x_ncl.shape[0]
    H = params["dc1_w"].shape[1]
    x = jnp.transpose(x_ncl, (0, 2, 1)).astype(jnp.float32)
    h = jax.nn.relu(_ref_conv_s2(x, params["ec1_w"], params["ec1_b"]))
    h = jax.nn.relu(_ref_conv_s2(h, params["ec2_w"], params["ec2_b"]))
    h = jax.nn.relu(_ref_conv_s2(h, params["ec3_w"], params["ec3_b"]))
    hf = h.reshape(B, -1)
    mu = hf @ params["fmu_w"] + params["fmu_b"]
    lv = hf @ params["flv_w"] + params["flv_b"]
    d = (mu @ params["dfc_w"] + params["dfc_b"]).reshape(B, -1, H)
    d = jax.nn.relu(_ref_deconv_s2(d, params["dc1_w"], params["dc1_b"]))
    d = jax.nn.relu(_ref_deconv_s2(d, params["dc2_w"], params["dc2_b"]))
    xh = _ref_deconv_s2(d, params["dc3_w"], params["dc3_b"])
    return jnp.transpose(xh, (0, 2, 1)), mu, lv


if __name__ == "__main__":
    batch, num_steps, num_features = 2, 16, 3
    num_hiddens, num_embeddings = 32, 8

    key = jax.random.PRNGKey(0)
    k_param, k_x = jax.random.split(key)
    params = init_params(k_param, num_steps, num_features, num_hiddens, num_embeddings)
    x = jax.random.normal(k_x, (batch, num_features, num_steps), jnp.float32)

    fwd = jax.jit(conv_vae_forward)
    x_hat, mu, logvar = fwd(params, x)
    jax.block_until_ready((x_hat, mu, logvar))

    assert x_hat.shape == (batch, num_features, num_steps), x_hat.shape
    assert mu.shape == (batch, num_embeddings), mu.shape
    assert logvar.shape == (batch, num_embeddings), logvar.shape
    assert bool(jnp.all(jnp.isfinite(x_hat)))

    # correctness vs. pure-JAX f32 reference (bf16 MXU operands -> loose tolerance)
    xr, mur, lvr = _ref_forward(params, x)
    for got, want, tol in ((mu, mur, 4e-2), (logvar, lvr, 4e-2), (x_hat, xr, 8e-2)):
        err = float(jnp.max(jnp.abs(got.astype(jnp.float32) - want)))
        assert err <= tol, f"max abs err {err} > {tol}"
    print("KERNEL_OK")
</pallas_src>

<mosaic_0001>
module attributes {stable_mosaic.version = 11 : i64} {
  func.func @_latent_kernel(%arg0: i32, %arg1: memref<2x64xbf16, #tpu.memory_space<vmem>>, %arg2: memref<64x8xbf16, #tpu.memory_space<vmem>>, %arg3: memref<1x8xf32, #tpu.memory_space<vmem>>, %arg4: memref<64x8xbf16, #tpu.memory_space<vmem>>, %arg5: memref<1x8xf32, #tpu.memory_space<vmem>>, %arg6: memref<8x64xbf16, #tpu.memory_space<vmem>>, %arg7: memref<1x64xf32, #tpu.memory_space<vmem>>, %arg8: memref<2x8xf32, #tpu.memory_space<vmem>>, %arg9: memref<2x8xf32, #tpu.memory_space<vmem>>, %arg10: memref<2x64xbf16, #tpu.memory_space<vmem>>) attributes {dimension_semantics = [#tpu.dimension_semantics<arbitrary>], iteration_bounds = array<i64: 1>, scalar_prefetch = 0 : i64, scratch_operands = 0 : i64, tpu.core_type = #tpu.core_type<tc>, window_params = [{pipeline_mode = #tpu.pipeline_mode<synchronous>, transform_indices = @transform_0, window_bounds = array<i64: 2, 64>}, {pipeline_mode = #tpu.pipeline_mode<synchronous>, transform_indices = @transform_1, window_bounds = array<i64: 64, 8>}, {pipeline_mode = #tpu.pipeline_mode<synchronous>, transform_indices = @transform_2, window_bounds = array<i64: 1, 8>}, {pipeline_mode = #tpu.pipeline_mode<synchronous>, transform_indices = @transform_3, window_bounds = array<i64: 64, 8>}, {pipeline_mode = #tpu.pipeline_mode<synchronous>, transform_indices = @transform_4, window_bounds = array<i64: 1, 8>}, {pipeline_mode = #tpu.pipeline_mode<synchronous>, transform_indices = @transform_5, window_bounds = array<i64: 8, 64>}, {pipeline_mode = #tpu.pipeline_mode<synchronous>, transform_indices = @transform_6, window_bounds = array<i64: 1, 64>}, {pipeline_mode = #tpu.pipeline_mode<synchronous>, transform_indices = @transform_7, window_bounds = array<i64: 2, 8>}, {pipeline_mode = #tpu.pipeline_mode<synchronous>, transform_indices = @transform_8, window_bounds = array<i64: 2, 8>}, {pipeline_mode = #tpu.pipeline_mode<synchronous>, transform_indices = @transform_9, window_bounds = array<i64: 2, 64>}]} {
    %c0 = arith.constant 0 : index
    %c0_0 = arith.constant 0 : index
    %0 = vector.load %arg1[%c0, %c0_0] : memref<2x64xbf16, #tpu.memory_space<vmem>>, vector<2x64xbf16>
    %c0_1 = arith.constant 0 : index
    %c0_2 = arith.constant 0 : index
    %1 = vector.load %arg2[%c0_1, %c0_2] : memref<64x8xbf16, #tpu.memory_space<vmem>>, vector<64x8xbf16>
    %cst = arith.constant dense<0.000000e+00> : vector<2x8xf32>
    %2 = tpu.matmul %0, %1, %cst {dimension_numbers = #tpu.dot_dimension_numbers<[1], [0], [0], [1], [0, 0, 1, 1], [], []>} : vector<2x64xbf16>, vector<64x8xbf16>, vector<2x8xf32> -> vector<2x8xf32>
    %c0_3 = arith.constant 0 : index
    %c0_4 = arith.constant 0 : index
    %3 = vector.load %arg3[%c0_3, %c0_4] : memref<1x8xf32, #tpu.memory_space<vmem>>, vector<1x8xf32>
    %4 = vector.broadcast %3 : vector<1x8xf32> to vector<2x8xf32>
    %5 = arith.addf %2, %4 : vector<2x8xf32>
    %c0_5 = arith.constant 0 : index
    %c0_6 = arith.constant 0 : index
    %6 = vector.load %arg4[%c0_5, %c0_6] : memref<64x8xbf16, #tpu.memory_space<vmem>>, vector<64x8xbf16>
    %cst_7 = arith.constant dense<0.000000e+00> : vector<2x8xf32>
    %7 = tpu.matmul %0, %6, %cst_7 {dimension_numbers = #tpu.dot_dimension_numbers<[1], [0], [0], [1], [0, 0, 1, 1], [], []>} : vector<2x64xbf16>, vector<64x8xbf16>, vector<2x8xf32> -> vector<2x8xf32>
    %c0_8 = arith.constant 0 : index
    %c0_9 = arith.constant 0 : index
    %8 = vector.load %arg5[%c0_8, %c0_9] : memref<1x8xf32, #tpu.memory_space<vmem>>, vector<1x8xf32>
    %9 = vector.broadcast %8 : vector<1x8xf32> to vector<2x8xf32>
    %10 = arith.addf %7, %9 : vector<2x8xf32>
    %11 = arith.truncf %5 : vector<2x8xf32> to vector<2x8xbf16>
    %c0_10 = arith.constant 0 : index
    %c0_11 = arith.constant 0 : index
    %12 = vector.load %arg6[%c0_10, %c0_11] : memref<8x64xbf16, #tpu.memory_space<vmem>>, vector<8x64xbf16>
    %cst_12 = arith.constant dense<0.000000e+00> : vector<2x64xf32>
    %13 = tpu.matmul %11, %12, %cst_12 {dimension_numbers = #tpu.dot_dimension_numbers<[1], [0], [0], [1], [0, 0, 1, 1], [], []>} : vector<2x8xbf16>, vector<8x64xbf16>, vector<2x64xf32> -> vector<2x64xf32>
    %c0_13 = arith.constant 0 : index
    %c0_14 = arith.constant 0 : index
    %14 = vector.load %arg7[%c0_13, %c0_14] : memref<1x64xf32, #tpu.memory_space<vmem>>, vector<1x64xf32>
    %15 = vector.broadcast %14 : vector<1x64xf32> to vector<2x64xf32>
    %16 = arith.addf %13, %15 : vector<2x64xf32>
    %c0_15 = arith.constant 0 : index
    %c0_16 = arith.constant 0 : index
    %17 = vector.load %arg8[%c0_15, %c0_16] : memref<2x8xf32, #tpu.memory_space<vmem>>, vector<2x8xf32>
    tpu.vector_store %arg8[%c0_15, %c0_16], %5 {strides = array<i32>} : memref<2x8xf32, #tpu.memory_space<vmem>>, vector<2x8xf32>,
    %c0_17 = arith.constant 0 : index
    %c0_18 = arith.constant 0 : index
    %18 = vector.load %arg9[%c0_17, %c0_18] : memref<2x8xf32, #tpu.memory_space<vmem>>, vector<2x8xf32>
    tpu.vector_store %arg9[%c0_17, %c0_18], %10 {strides = array<i32>} : memref<2x8xf32, #tpu.memory_space<vmem>>, vector<2x8xf32>,
    %19 = arith.truncf %16 : vector<2x64xf32> to vector<2x64xbf16>
    %c0_19 = arith.constant 0 : index
    %c0_20 = arith.constant 0 : index
    %20 = vector.load %arg10[%c0_19, %c0_20] : memref<2x64xbf16, #tpu.memory_space<vmem>>, vector<2x64xbf16>
    tpu.vector_store %arg10[%c0_19, %c0_20], %19 {strides = array<i32>} : memref<2x64xbf16, #tpu.memory_space<vmem>>, vector<2x64xbf16>,
    return
  }
  func.func @transform_0(%arg0: i32) -> (i32, i32) {
    %c0_i32 = arith.constant 0 : i32
    %c0_i32_0 = arith.constant 0 : i32
    %c0_i32_1 = arith.constant 0 : i32
    return %c0_i32, %c0_i32_0 : i32, i32
  }
  func.func @transform_1(%arg0: i32) -> (i32, i32) {
    %c0_i32 = arith.constant 0 : i32
    %c0_i32_0 = arith.constant 0 : i32
    %c0_i32_1 = arith.constant 0 : i32
    return %c0_i32, %c0_i32_0 : i32, i32
  }
  func.func @transform_2(%arg0: i32) -> (i32, i32) {
    %c0_i32 = arith.constant 0 : i32
    %c0_i32_0 = arith.constant 0 : i32
    %c0_i32_1 = arith.constant 0 : i32
    return %c0_i32, %c0_i32_0 : i32, i32
  }
  func.func @transform_3(%arg0: i32) -> (i32, i32) {
    %c0_i32 = arith.constant 0 : i32
    %c0_i32_0 = arith.constant 0 : i32
    %c0_i32_1 = arith.constant 0 : i32
    return %c0_i32, %c0_i32_0 : i32, i32
  }
  func.func @transform_4(%arg0: i32) -> (i32, i32) {
    %c0_i32 = arith.constant 0 : i32
    %c0_i32_0 = arith.constant 0 : i32
    %c0_i32_1 = arith.constant 0 : i32
    return %c0_i32, %c0_i32_0 : i32, i32
  }
  func.func @transform_5(%arg0: i32) -> (i32, i32) {
    %c0_i32 = arith.constant 0 : i32
    %c0_i32_0 = arith.constant 0 : i32
    %c0_i32_1 = arith.constant 0 : i32
    return %c0_i32, %c0_i32_0 : i32, i32
  }
  func.func @transform_6(%arg0: i32) -> (i32, i32) {
    %c0_i32 = arith.constant 0 : i32
    %c0_i32_0 = arith.constant 0 : i32
    %c0_i32_1 = arith.constant 0 : i32
    return %c0_i32, %c0_i32_0 : i32, i32
  }
  func.func @transform_7(%arg0: i32) -> (i32, i32) {
    %c0_i32 = arith.constant 0 : i32
    %c0_i32_0 = arith.constant 0 : i32
    %c0_i32_1 = arith.constant 0 : i32
    return %c0_i32, %c0_i32_0 : i32, i32
  }
  func.func @transform_8(%arg0: i32) -> (i32, i32) {
    %c0_i32 = arith.constant 0 : i32
    %c0_i32_0 = arith.constant 0 : i32
    %c0_i32_1 = arith.constant 0 : i32
    return %c0_i32, %c0_i32_0 : i32, i32
  }
  func.func @transform_9(%arg0: i32) -> (i32, i32) {
    %c0_i32 = arith.constant 0 : i32
    %c0_i32_0 = arith.constant 0 : i32
    %c0_i32_1 = arith.constant 0 : i32
    return %c0_i32, %c0_i32_0 : i32, i32
  }
}

module attributes {stable_mosaic.version = 11 : i64} {
  func.func @_encoder_kernel(%arg0: i32, %arg1: memref<1x8x2x3xbf16, #tpu.memory_space<vmem>>, %arg2: memref<3x3x32xbf16, #tpu.memory_space<vmem>>, %arg3: memref<1x32xf32, #tpu.memory_space<vmem>>, %arg4: memref<3x32x32xbf16, #tpu.memory_space<vmem>>, %arg5: memref<1x32xf32, #tpu.memory_space<vmem>>, %arg6: memref<3x32x32xbf16, #tpu.memory_space<vmem>>, %arg7: memref<1x32xf32, #tpu.memory_space<vmem>>, %arg8: memref<1x2x32xbf16, #tpu.memory_space<vmem>>) attributes {dimension_semantics = [#tpu.dimension_semantics<parallel>], iteration_bounds = array<i64: 2>, scalar_prefetch = 0 : i64, scratch_operands = 0 : i64, tpu.core_type = #tpu.core_type<tc>, window_params = [{transform_indices = @transform_0, window_bounds = array<i64: 1, 8, 2, 3>}, {pipeline_mode = #tpu.pipeline_mode<synchronous>, transform_indices = @transform_1, window_bounds = array<i64: 3, 3, 32>}, {pipeline_mode = #tpu.pipeline_mode<synchronous>, transform_indices = @transform_2, window_bounds = array<i64: 1, 32>}, {pipeline_mode = #tpu.pipeline_mode<synchronous>, transform_indices = @transform_3, window_bounds = array<i64: 3, 32, 32>}, {pipeline_mode = #tpu.pipeline_mode<synchronous>, transform_indices = @transform_4, window_bounds = array<i64: 1, 32>}, {pipeline_mode = #tpu.pipeline_mode<synchronous>, transform_indices = @transform_5, window_bounds = array<i64: 3, 32, 32>}, {pipeline_mode = #tpu.pipeline_mode<synchronous>, transform_indices = @transform_6, window_bounds = array<i64: 1, 32>}, {transform_indices = @transform_7, window_bounds = array<i64: 1, 2, 32>}]} {
    %c0 = arith.constant 0 : index
    %c0_0 = arith.constant 0 : index
    %c0_1 = arith.constant 0 : index
    %c0_2 = arith.constant 0 : index
    %0 = vector.load %arg1[%c0, %c0_0, %c0_1, %c0_2] : memref<1x8x2x3xbf16, #tpu.memory_space<vmem>>, vector<1x1x2x3xbf16>
    %1 = vector.shape_cast %0 : vector<1x1x2x3xbf16> to vector<2x3xbf16>
    %c0_3 = arith.constant 0 : index
    %c1 = arith.constant 1 : index
    %c0_4 = arith.constant 0 : index
    %c0_5 = arith.constant 0 : index
    %2 = vector.load %arg1[%c0_3, %c1, %c0_4, %c0_5] : memref<1x8x2x3xbf16, #tpu.memory_space<vmem>>, vector<1x1x2x3xbf16>
    %3 = vector.shape_cast %2 : vector<1x1x2x3xbf16> to vector<2x3xbf16>
    %c0_6 = arith.constant 0 : index
    %c2 = arith.constant 2 : index
    %c0_7 = arith.constant 0 : index
    %c0_8 = arith.constant 0 : index
    %4 = vector.load %arg1[%c0_6, %c2, %c0_7, %c0_8] : memref<1x8x2x3xbf16, #tpu.memory_space<vmem>>, vector<1x1x2x3xbf16>
    %5 = vector.shape_cast %4 : vector<1x1x2x3xbf16> to vector<2x3xbf16>
    %c0_9 = arith.constant 0 : index
    %c3 = arith.constant 3 : index
    %c0_10 = arith.constant 0 : index
    %c0_11 = arith.constant 0 : index
    %6 = vector.load %arg1[%c0_9, %c3, %c0_10, %c0_11] : memref<1x8x2x3xbf16, #tpu.memory_space<vmem>>, vector<1x1x2x3xbf16>
    %7 = vector.shape_cast %6 : vector<1x1x2x3xbf16> to vector<2x3xbf16>
    %c0_12 = arith.constant 0 : index
    %c4 = arith.constant 4 : index
    %c0_13 = arith.constant 0 : index
    %c0_14 = arith.constant 0 : index
    %8 = vector.load %arg1[%c0_12, %c4, %c0_13, %c0_14] : memref<1x8x2x3xbf16, #tpu.memory_space<vmem>>, vector<1x1x2x3xbf16>
    %9 = vector.shape_cast %8 : vector<1x1x2x3xbf16> to vector<2x3xbf16>
    %c0_15 = arith.constant 0 : index
    %c5 = arith.constant 5 : index
    %c0_16 = arith.constant 0 : index
    %c0_17 = arith.constant 0 : index
    %10 = vector.load %arg1[%c0_15, %c5, %c0_16, %c0_17] : memref<1x8x2x3xbf16, #tpu.memory_space<vmem>>, vector<1x1x2x3xbf16>
    %11 = vector.shape_cast %10 : vector<1x1x2x3xbf16> to vector<2x3xbf16>
    %c0_18 = arith.constant 0 : index
    %c6 = arith.constant 6 : index
    %c0_19 = arith.constant 0 : index
    %c0_20 = arith.constant 0 : index
    %12 = vector.load %arg1[%c0_18, %c6, %c0_19, %c0_20] : memref<1x8x2x3xbf16, #tpu.memory_space<vmem>>, vector<1x1x2x3xbf16>
    %13 = vector.shape_cast %12 : vector<1x1x2x3xbf16> to vector<2x3xbf16>
    %c0_21 = arith.constant 0 : index
    %c7 = arith.constant 7 : index
    %c0_22 = arith.constant 0 : index
    %c0_23 = arith.constant 0 : index
    %14 = vector.load %arg1[%c0_21, %c7, %c0_22, %c0_23] : memref<1x8x2x3xbf16, #tpu.memory_space<vmem>>, vector<1x1x2x3xbf16>
    %15 = vector.shape_cast %14 : vector<1x1x2x3xbf16> to vector<2x3xbf16>
    %c0_24 = arith.constant 0 : index
    %c0_25 = arith.constant 0 : index
    %16 = vector.load %arg3[%c0_24, %c0_25] : memref<1x32xf32, #tpu.memory_space<vmem>>, vector<1x32xf32>
    %c0_26 = arith.constant 0 : index
    %c0_27 = arith.constant 0 : index
    %c0_28 = arith.constant 0 : index
    %17 = vector.load %arg2[%c0_26, %c0_27, %c0_28] : memref<3x3x32xbf16, #tpu.memory_space<vmem>>, vector<1x3x32xbf16>
    %18 = vector.shape_cast %17 : vector<1x3x32xbf16> to vector<3x32xbf16>
    %c1_29 = arith.constant 1 : index
    %c0_30 = arith.constant 0 : index
    %c0_31 = arith.constant 0 : index
    %19 = vector.load %arg2[%c1_29, %c0_30, %c0_31] : memref<3x3x32xbf16, #tpu.memory_space<vmem>>, vector<1x3x32xbf16>
    %20 = vector.shape_cast %19 : vector<1x3x32xbf16> to vector<3x32xbf16>
    %c2_32 = arith.constant 2 : index
    %c0_33 = arith.constant 0 : index
    %c0_34 = arith.constant 0 : index
    %21 = vector.load %arg2[%c2_32, %c0_33, %c0_34] : memref<3x3x32xbf16, #tpu.memory_space<vmem>>, vector<1x3x32xbf16>
    %22 = vector.shape_cast %21 : vector<1x3x32xbf16> to vector<3x32xbf16>
    %cst = arith.constant dense<0.000000e+00> : vector<2x32xf32>
    %23 = tpu.matmul %15, %18, %cst {dimension_numbers = #tpu.dot_dimension_numbers<[1], [0], [0], [1], [0, 0, 1, 1], [], []>} : vector<2x3xbf16>, vector<3x32xbf16>, vector<2x32xf32> -> vector<2x32xf32>
    %cst_35 = arith.constant 0.000000e+00 : f32
    %24 = vector.broadcast %cst_35 : f32 to vector<1x32xf32>
    %25 = vector.extract_strided_slice %23 {offsets = [0, 0], sizes = [1, 32], strides = [1, 1]} : vector<2x32xf32> to vector<1x32xf32>
    %26 = tpu.concatenate %24, %25 in 0 : vector<1x32xf32>, vector<1x32xf32> -> vector<2x32xf32>
    %cst_36 = arith.constant dense<0.000000e+00> : vector<2x32xf32>
    %27 = tpu.matmul %1, %20, %cst_36 {dimension_numbers = #tpu.dot_dimension_numbers<[1], [0], [0], [1], [0, 0, 1, 1], [], []>} : vector<2x3xbf16>, vector<3x32xbf16>, vector<2x32xf32> -> vector<2x32xf32>
    %28 = arith.addf %26, %27 : vector<2x32xf32>
    %cst_37 = arith.constant dense<0.000000e+00> : vector<2x32xf32>
    %29 = tpu.matmul %3, %22, %cst_37 {dimension_numbers = #tpu.dot_dimension_numbers<[1], [0], [0], [1], [0, 0, 1, 1], [], []>} : vector<2x3xbf16>, vector<3x32xbf16>, vector<2x32xf32> -> vector<2x32xf32>
    %30 = arith.addf %28, %29 : vector<2x32xf32>
    %31 = vector.broadcast %16 : vector<1x32xf32> to vector<2x32xf32>
    %32 = arith.addf %30, %31 : vector<2x32xf32>
    %cst_38 = arith.constant 0.000000e+00 : f32
    %33 = vector.broadcast %cst_38 : f32 to vector<2x32xf32>
    %34 = arith.maximumf %32, %33 : vector<2x32xf32>
    %35 = arith.truncf %34 : vector<2x32xf32> to vector<2x32xbf16>
    %cst_39 = arith.constant dense<0.000000e+00> : vector<2x32xf32>
    %36 = tpu.matmul %3, %18, %cst_39 {dimension_numbers = #tpu.dot_dimension_numbers<[1], [0], [0], [1], [0, 0, 1, 1], [], []>} : vector<2x3xbf16>, vector<3x32xbf16>, vector<2x32xf32> -> vector<2x32xf32>
    %cst_40 = arith.constant dense<0.000000e+00> : vector<2x32xf32>
    %37 = tpu.matmul %5, %20, %cst_40 {dimension_numbers = #tpu.dot_dimension_numbers<[1], [0], [0], [1], [0, 0, 1, 1], [], []>} : vector<2x3xbf16>, vector<3x32xbf16>, vector<2x32xf32> -> vector<2x32xf32>
    %38 = arith.addf %36, %37 : vector<2x32xf32>
    %cst_41 = arith.constant dense<0.000000e+00> : vector<2x32xf32>
    %39 = tpu.matmul %7, %22, %cst_41 {dimension_numbers = #tpu.dot_dimension_numbers<[1], [0], [0], [1], [0, 0, 1, 1], [], []>} : vector<2x3xbf16>, vector<3x32xbf16>, vector<2x32xf32> -> vector<2x32xf32>
    %40 = arith.addf %38, %39 : vector<2x32xf32>
    %41 = vector.broadcast %16 : vector<1x32xf32> to vector<2x32xf32>
    %42 = arith.addf %40, %41 : vector<2x32xf32>
    %cst_42 = arith.constant 0.000000e+00 : f32
    %43 = vector.broadcast %cst_42 : f32 to vector<2x32xf32>
    %44 = arith.maximumf %42, %43 : vector<2x32xf32>
    %45 = arith.truncf %44 : vector<2x32xf32> to vector<2x32xbf16>
    %cst_43 = arith.constant dense<0.000000e+00> : vector<2x32xf32>
    %46 = tpu.matmul %7, %18, %cst_43 {dimension_numbers = #tpu.dot_dimension_numbers<[1], [0], [0], [1], [0, 0, 1, 1], [], []>} : vector<2x3xbf16>, vector<3x32xbf16>, vector<2x32xf32> -> vector<2x32xf32>
    %cst_44 = arith.constant dense<0.000000e+00> : vector<2x32xf32>
    %47 = tpu.matmul %9, %20, %cst_44 {dimension_numbers = #tpu.dot_dimension_numbers<[1], [0], [0], [1], [0, 0, 1, 1], [], []>} : vector<2x3xbf16>, vector<3x32xbf16>, vector<2x32xf32> -> vector<2x32xf32>
    %48 = arith.addf %46, %47 : vector<2x32xf32>
    %cst_45 = arith.constant dense<0.000000e+00> : vector<2x32xf32>
    %49 = tpu.matmul %11, %22, %cst_45 {dimension_numbers = #tpu.dot_dimension_numbers<[1], [0], [0], [1], [0, 0, 1, 1], [], []>} : vector<2x3xbf16>, vector<3x32xbf16>, vector<2x32xf32> -> vector<2x32xf32>
    %50 = arith.addf %48, %49 : vector<2x32xf32>
    %51 = vector.broadcast %16 : vector<1x32xf32> to vector<2x32xf32>
    %52 = arith.addf %50, %51 : vector<2x32xf32>
    %cst_46 = arith.constant 0.000000e+00 : f32
    %53 = vector.broadcast %cst_46 : f32 to vector<2x32xf32>
    %54 = arith.maximumf %52, %53 : vector<2x32xf32>
    %55 = arith.truncf %54 : vector<2x32xf32> to vector<2x32xbf16>
    %cst_47 = arith.constant dense<0.000000e+00> : vector<2x32xf32>
    %56 = tpu.matmul %11, %18, %cst_47 {dimension_numbers = #tpu.dot_dimension_numbers<[1], [0], [0], [1], [0, 0, 1, 1], [], []>} : vector<2x3xbf16>, vector<3x32xbf16>, vector<2x32xf32> -> vector<2x32xf32>
    %cst_48 = arith.constant dense<0.000000e+00> : vector<2x32xf32>
    %57 = tpu.matmul %13, %20, %cst_48 {dimension_numbers = #tpu.dot_dimension_numbers<[1], [0], [0], [1], [0, 0, 1, 1], [], []>} : vector<2x3xbf16>, vector<3x32xbf16>, vector<2x32xf32> -> vector<2x32xf32>
    %58 = arith.addf %56, %57 : vector<2x32xf32>
    %cst_49 = arith.constant dense<0.000000e+00> : vector<2x32xf32>
    %59 = tpu.matmul %15, %22, %cst_49 {dimension_numbers = #tpu.dot_dimension_numbers<[1], [0], [0], [1], [0, 0, 1, 1], [], []>} : vector<2x3xbf16>, vector<3x32xbf16>, vector<2x32xf32> -> vector<2x32xf32>
    %60 = arith.addf %58, %59 : vector<2x32xf32>
    %61 = vector.broadcast %16 : vector<1x32xf32> to vector<2x32xf32>
    %62 = arith.addf %60, %61 : vector<2x32xf32>
    %cst_50 = arith.constant 0.000000e+00 : f32
    %63 = vector.broadcast %cst_50 : f32 to vector<2x32xf32>
    %64 = arith.maximumf %62, %63 : vector<2x32xf32>
    %65 = arith.truncf %64 : vector<2x32xf32> to vector<2x32xbf16>
    %c0_51 = arith.constant 0 : index
    %c0_52 = arith.constant 0 : index
    %66 = vector.load %arg5[%c0_51, %c0_52] : memref<1x32xf32, #tpu.memory_space<vmem>>, vector<1x32xf32>
    %c0_53 = arith.constant 0 : index
    %c0_54 = arith.constant 0 : index
    %c0_55 = arith.constant 0 : index
    %67 = vector.load %arg4[%c0_53, %c0_54, %c0_55] : memref<3x32x32xbf16, #tpu.memory_space<vmem>>, vector<1x32x32xbf16>
    %68 = vector.shape_cast %67 : vector<1x32x32xbf16> to vector<32x32xbf16>
    %c1_56 = arith.constant 1 : index
    %c0_57 = arith.constant 0 : index
    %c0_58 = arith.constant 0 : index
    %69 = vector.load %arg4[%c1_56, %c0_57, %c0_58] : memref<3x32x32xbf16, #tpu.memory_space<vmem>>, vector<1x32x32xbf16>
    %70 = vector.shape_cast %69 : vector<1x32x32xbf16> to vector<32x32xbf16>
    %c2_59 = arith.constant 2 : index
    %c0_60 = arith.constant 0 : index
    %c0_61 = arith.constant 0 : index
    %71 = vector.load %arg4[%c2_59, %c0_60, %c0_61] : memref<3x32x32xbf16, #tpu.memory_space<vmem>>, vector<1x32x32xbf16>
    %72 = vector.shape_cast %71 : vector<1x32x32xbf16> to vector<32x32xbf16>
    %cst_62 = arith.constant dense<0.000000e+00> : vector<2x32xf32>
    %73 = tpu.matmul %65, %68, %cst_62 {dimension_numbers = #tpu.dot_dimension_numbers<[1], [0], [0], [1], [0, 0, 1, 1], [], []>} : vector<2x32xbf16>, vector<32x32xbf16>, vector<2x32xf32> -> vector<2x32xf32>
    %cst_63 = arith.constant 0.000000e+00 : f32
    %74 = vector.broadcast %cst_63 : f32 to vector<1x32xf32>
    %75 = vector.extract_strided_slice %73 {offsets = [0, 0], sizes = [1, 32], strides = [1, 1]} : vector<2x32xf32> to vector<1x32xf32>
    %76 = tpu.concatenate %74, %75 in 0 : vector<1x32xf32>, vector<1x32xf32> -> vector<2x32xf32>
    %cst_64 = arith.constant dense<0.000000e+00> : vector<2x32xf32>
    %77 = tpu.matmul %35, %70, %cst_64 {dimension_numbers = #tpu.dot_dimension_numbers<[1], [0], [0], [1], [0, 0, 1, 1], [], []>} : vector<2x32xbf16>, vector<32x32xbf16>, vector<2x32xf32> -> vector<2x32xf32>
    %78 = arith.addf %76, %77 : vector<2x32xf32>
    %cst_65 = arith.constant dense<0.000000e+00> : vector<2x32xf32>
    %79 = tpu.matmul %45, %72, %cst_65 {dimension_numbers = #tpu.dot_dimension_numbers<[1], [0], [0], [1], [0, 0, 1, 1], [], []>} : vector<2x32xbf16>, vector<32x32xbf16>, vector<2x32xf32> -> vector<2x32xf32>
    %80 = arith.addf %78, %79 : vector<2x32xf32>
    %81 = vector.broadcast %66 : vector<1x32xf32> to vector<2x32xf32>
    %82 = arith.addf %80, %81 : vector<2x32xf32>
    %cst_66 = arith.constant 0.000000e+00 : f32
    %83 = vector.broadcast %cst_66 : f32 to vector<2x32xf32>
    %84 = arith.maximumf %82, %83 : vector<2x32xf32>
    %85 = arith.truncf %84 : vector<2x32xf32> to vector<2x32xbf16>
    %cst_67 = arith.constant dense<0.000000e+00> : vector<2x32xf32>
    %86 = tpu.matmul %45, %68, %cst_67 {dimension_numbers = #tpu.dot_dimension_numbers<[1], [0], [0], [1], [0, 0, 1, 1], [], []>} : vector<2x32xbf16>, vector<32x32xbf16>, vector<2x32xf32> -> vector<2x32xf32>
    %cst_68 = arith.constant dense<0.000000e+00> : vector<2x32xf32>
    %87 = tpu.matmul %55, %70, %cst_68 {dimension_numbers = #tpu.dot_dimension_numbers<[1], [0], [0], [1], [0, 0, 1, 1], [], []>} : vector<2x32xbf16>, vector<32x32xbf16>, vector<2x32xf32> -> vector<2x32xf32>
    %88 = arith.addf %86, %87 : vector<2x32xf32>
    %cst_69 = arith.constant dense<0.000000e+00> : vector<2x32xf32>
    %89 = tpu.matmul %65, %72, %cst_69 {dimension_numbers = #tpu.dot_dimension_numbers<[1], [0], [0], [1], [0, 0, 1, 1], [], []>} : vector<2x32xbf16>, vector<32x32xbf16>, vector<2x32xf32> -> vector<2x32xf32>
    %90 = arith.addf %88, %89 : vector<2x32xf32>
    %91 = vector.broadcast %66 : vector<1x32xf32> to vector<2x32xf32>
    %92 = arith.addf %90, %91 : vector<2x32xf32>
    %cst_70 = arith.constant 0.000000e+00 : f32
    %93 = vector.broadcast %cst_70 : f32 to vector<2x32xf32>
    %94 = arith.maximumf %92, %93 : vector<2x32xf32>
    %95 = arith.truncf %94 : vector<2x32xf32> to vector<2x32xbf16>
    %c0_71 = arith.constant 0 : index
    %c0_72 = arith.constant 0 : index
    %96 = vector.load %arg7[%c0_71, %c0_72] : memref<1x32xf32, #tpu.memory_space<vmem>>, vector<1x32xf32>
    %c0_73 = arith.constant 0 : index
    %c0_74 = arith.constant 0 : index
    %c0_75 = arith.constant 0 : index
    %97 = vector.load %arg6[%c0_73, %c0_74, %c0_75] : memref<3x32x32xbf16, #tpu.memory_space<vmem>>, vector<1x32x32xbf16>
    %98 = vector.shape_cast %97 : vector<1x32x32xbf16> to vector<32x32xbf16>
    %c1_76 = arith.constant 1 : index
    %c0_77 = arith.constant 0 : index
    %c0_78 = arith.constant 0 : index
    %99 = vector.load %arg6[%c1_76, %c0_77, %c0_78] : memref<3x32x32xbf16, #tpu.memory_space<vmem>>, vector<1x32x32xbf16>
    %100 = vector.shape_cast %99 : vector<1x32x32xbf16> to vector<32x32xbf16>
    %c2_79 = arith.constant 2 : index
    %c0_80 = arith.constant 0 : index
    %c0_81 = arith.constant 0 : index
    %101 = vector.load %arg6[%c2_79, %c0_80, %c0_81] : memref<3x32x32xbf16, #tpu.memory_space<vmem>>, vector<1x32x32xbf16>
    %102 = vector.shape_cast %101 : vector<1x32x32xbf16> to vector<32x32xbf16>
    %cst_82 = arith.constant dense<0.000000e+00> : vector<2x32xf32>
    %103 = tpu.matmul %95, %98, %cst_82 {dimension_numbers = #tpu.dot_dimension_numbers<[1], [0], [0], [1], [0, 0, 1, 1], [], []>} : vector<2x32xbf16>, vector<32x32xbf16>, vector<2x32xf32> -> vector<2x32xf32>
    %cst_83 = arith.constant 0.000000e+00 : f32
    %104 = vector.broadcast %cst_83 : f32 to vector<1x32xf32>
    %105 = vector.extract_strided_slice %103 {offsets = [0, 0], sizes = [1, 32], strides = [1, 1]} : vector<2x32xf32> to vector<1x32xf32>
    %106 = tpu.concatenate %104, %105 in 0 : vector<1x32xf32>, vector<1x32xf32> -> vector<2x32xf32>
    %cst_84 = arith.constant dense<0.000000e+00> : vector<2x32xf32>
    %107 = tpu.matmul %85, %100, %cst_84 {dimension_numbers = #tpu.dot_dimension_numbers<[1], [0], [0], [1], [0, 0, 1, 1], [], []>} : vector<2x32xbf16>, vector<32x32xbf16>, vector<2x32xf32> -> vector<2x32xf32>
    %108 = arith.addf %106, %107 : vector<2x32xf32>
    %cst_85 = arith.constant dense<0.000000e+00> : vector<2x32xf32>
    %109 = tpu.matmul %95, %102, %cst_85 {dimension_numbers = #tpu.dot_dimension_numbers<[1], [0], [0], [1], [0, 0, 1, 1], [], []>} : vector<2x32xbf16>, vector<32x32xbf16>, vector<2x32xf32> -> vector<2x32xf32>
    %110 = arith.addf %108, %109 : vector<2x32xf32>
    %111 = vector.broadcast %96 : vector<1x32xf32> to vector<2x32xf32>
    %112 = arith.addf %110, %111 : vector<2x32xf32>
    %cst_86 = arith.constant 0.000000e+00 : f32
    %113 = vector.broadcast %cst_86 : f32 to vector<2x32xf32>
    %114 = arith.maximumf %112, %113 : vector<2x32xf32>
    %115 = arith.truncf %114 : vector<2x32xf32> to vector<2x32xbf16>
    %c0_87 = arith.constant 0 : index
    %c0_88 = arith.constant 0 : index
    %c0_89 = arith.constant 0 : index
    %116 = vector.load %arg8[%c0_87, %c0_88, %c0_89] : memref<1x2x32xbf16, #tpu.memory_space<vmem>>, vector<1x2x32xbf16>
    %117 = vector.shape_cast %116 : vector<1x2x32xbf16> to vector<2x32xbf16>
    %118 = vector.shape_cast %115 : vector<2x32xbf16> to vector<1x2x32xbf16>
    tpu.vector_store %arg8[%c0_87, %c0_88, %c0_89], %118 {strides = array<i32>} : memref<1x2x32xbf16, #tpu.memory_space<vmem>>, vector<1x2x32xbf16>,
    return
  }
  func.func @transform_0(%arg0: i32) -> (i32, i32, i32, i32) {
    %c0_i32 = arith.constant 0 : i32
    %c0_i32_0 = arith.constant 0 : i32
    %c0_i32_1 = arith.constant 0 : i32
    %c0_i32_2 = arith.constant 0 : i32
    return %arg0, %c0_i32, %c0_i32_0, %c0_i32_1 : i32, i32, i32, i32
  }
  func.func @transform_1(%arg0: i32) -> (i32, i32, i32) {
    %c0_i32 = arith.constant 0 : i32
    %c0_i32_0 = arith.constant 0 : i32
    %c0_i32_1 = arith.constant 0 : i32
    %c0_i32_2 = arith.constant 0 : i32
    return %c0_i32, %c0_i32_0, %c0_i32_1 : i32, i32, i32
  }
  func.func @transform_2(%arg0: i32) -> (i32, i32) {
    %c0_i32 = arith.constant 0 : i32
    %c0_i32_0 = arith.constant 0 : i32
    %c0_i32_1 = arith.constant 0 : i32
    return %c0_i32, %c0_i32_0 : i32, i32
  }
  func.func @transform_3(%arg0: i32) -> (i32, i32, i32) {
    %c0_i32 = arith.constant 0 : i32
    %c0_i32_0 = arith.constant 0 : i32
    %c0_i32_1 = arith.constant 0 : i32
    %c0_i32_2 = arith.constant 0 : i32
    return %c0_i32, %c0_i32_0, %c0_i32_1 : i32, i32, i32
  }
  func.func @transform_4(%arg0: i32) -> (i32, i32) {
    %c0_i32 = arith.constant 0 : i32
    %c0_i32_0 = arith.constant 0 : i32
    %c0_i32_1 = arith.constant 0 : i32
    return %c0_i32, %c0_i32_0 : i32, i32
  }
  func.func @transform_5(%arg0: i32) -> (i32, i32, i32) {
    %c0_i32 = arith.constant 0 : i32
    %c0_i32_0 = arith.constant 0 : i32
    %c0_i32_1 = arith.constant 0 : i32
    %c0_i32_2 = arith.constant 0 : i32
    return %c0_i32, %c0_i32_0, %c0_i32_1 : i32, i32, i32
  }
  func.func @transform_6(%arg0: i32) -> (i32, i32) {
    %c0_i32 = arith.constant 0 : i32
    %c0_i32_0 = arith.constant 0 : i32
    %c0_i32_1 = arith.constant 0 : i32
    return %c0_i32, %c0_i32_0 : i32, i32
  }
  func.func @transform_7(%arg0: i32) -> (i32, i32, i32) {
    %c0_i32 = arith.constant 0 : i32
    %c0_i32_0 = arith.constant 0 : i32
    %c0_i32_1 = arith.constant 0 : i32
    return %arg0, %c0_i32, %c0_i32_0 : i32, i32, i32
  }
}

module attributes {stable_mosaic.version = 11 : i64} {
  func.func @_decoder_kernel(%arg0: i32, %arg1: memref<1x2x32xbf16, #tpu.memory_space<vmem>>, %arg2: memref<3x32x32xbf16, #tpu.memory_space<vmem>>, %arg3: memref<1x32xf32, #tpu.memory_space<vmem>>, %arg4: memref<3x32x32xbf16, #tpu.memory_space<vmem>>, %arg5: memref<1x32xf32, #tpu.memory_space<vmem>>, %arg6: memref<3x32x3xbf16, #tpu.memory_space<vmem>>, %arg7: memref<1x3xf32, #tpu.memory_space<vmem>>, %arg8: memref<1x8x2x3xf32, #tpu.memory_space<vmem>>) attributes {dimension_semantics = [#tpu.dimension_semantics<parallel>], iteration_bounds = array<i64: 2>, scalar_prefetch = 0 : i64, scratch_operands = 0 : i64, tpu.core_type = #tpu.core_type<tc>, window_params = [{transform_indices = @transform_0, window_bounds = array<i64: 1, 2, 32>}, {pipeline_mode = #tpu.pipeline_mode<synchronous>, transform_indices = @transform_1, window_bounds = array<i64: 3, 32, 32>}, {pipeline_mode = #tpu.pipeline_mode<synchronous>, transform_indices = @transform_2, window_bounds = array<i64: 1, 32>}, {pipeline_mode = #tpu.pipeline_mode<synchronous>, transform_indices = @transform_3, window_bounds = array<i64: 3, 32, 32>}, {pipeline_mode = #tpu.pipeline_mode<synchronous>, transform_indices = @transform_4, window_bounds = array<i64: 1, 32>}, {pipeline_mode = #tpu.pipeline_mode<synchronous>, transform_indices = @transform_5, window_bounds = array<i64: 3, 32, 3>}, {pipeline_mode = #tpu.pipeline_mode<synchronous>, transform_indices = @transform_6, window_bounds = array<i64: 1, 3>}, {transform_indices = @transform_7, window_bounds = array<i64: 1, 8, 2, 3>}]} {
    %c0 = arith.constant 0 : index
    %c0_0 = arith.constant 0 : index
    %c0_1 = arith.constant 0 : index
    %0 = vector.load %arg1[%c0, %c0_0, %c0_1] : memref<1x2x32xbf16, #tpu.memory_space<vmem>>, vector<1x2x32xbf16>
    %1 = vector.shape_cast %0 : vector<1x2x32xbf16> to vector<2x32xbf16>
    %c0_2 = arith.constant 0 : index
    %c0_3 = arith.constant 0 : index
    %2 = vector.load %arg3[%c0_2, %c0_3] : memref<1x32xf32, #tpu.memory_space<vmem>>, vector<1x32xf32>
    %c0_4 = arith.constant 0 : index
    %c0_5 = arith.constant 0 : index
    %c0_6 = arith.constant 0 : index
    %3 = vector.load %arg2[%c0_4, %c0_5, %c0_6] : memref<3x32x32xbf16, #tpu.memory_space<vmem>>, vector<1x32x32xbf16>
    %4 = vector.shape_cast %3 : vector<1x32x32xbf16> to vector<32x32xbf16>
    %c1 = arith.constant 1 : index
    %c0_7 = arith.constant 0 : index
    %c0_8 = arith.constant 0 : index
    %5 = vector.load %arg2[%c1, %c0_7, %c0_8] : memref<3x32x32xbf16, #tpu.memory_space<vmem>>, vector<1x32x32xbf16>
    %6 = vector.shape_cast %5 : vector<1x32x32xbf16> to vector<32x32xbf16>
    %c2 = arith.constant 2 : index
    %c0_9 = arith.constant 0 : index
    %c0_10 = arith.constant 0 : index
    %7 = vector.load %arg2[%c2, %c0_9, %c0_10] : memref<3x32x32xbf16, #tpu.memory_space<vmem>>, vector<1x32x32xbf16>
    %8 = vector.shape_cast %7 : vector<1x32x32xbf16> to vector<32x32xbf16>
    %cst = arith.constant dense<0.000000e+00> : vector<2x32xf32>
    %9 = tpu.matmul %1, %4, %cst {dimension_numbers = #tpu.dot_dimension_numbers<[1], [0], [0], [1], [0, 0, 1, 1], [], []>} : vector<2x32xbf16>, vector<32x32xbf16>, vector<2x32xf32> -> vector<2x32xf32>
    %10 = vector.extract_strided_slice %9 {offsets = [1, 0], sizes = [1, 32], strides = [1, 1]} : vector<2x32xf32> to vector<1x32xf32>
    %cst_11 = arith.constant 0.000000e+00 : f32
    %11 = vector.broadcast %cst_11 : f32 to vector<1x32xf32>
    %12 = tpu.concatenate %10, %11 in 0 : vector<1x32xf32>, vector<1x32xf32> -> vector<2x32xf32>
    %cst_12 = arith.constant dense<0.000000e+00> : vector<2x32xf32>
    %13 = tpu.matmul %1, %6, %cst_12 {dimension_numbers = #tpu.dot_dimension_numbers<[1], [0], [0], [1], [0, 0, 1, 1], [], []>} : vector<2x32xbf16>, vector<32x32xbf16>, vector<2x32xf32> -> vector<2x32xf32>
    %14 = vector.broadcast %2 : vector<1x32xf32> to vector<2x32xf32>
    %15 = arith.addf %13, %14 : vector<2x32xf32>
    %cst_13 = arith.constant dense<0.000000e+00> : vector<2x32xf32>
    %16 = tpu.matmul %1, %8, %cst_13 {dimension_numbers = #tpu.dot_dimension_numbers<[1], [0], [0], [1], [0, 0, 1, 1], [], []>} : vector<2x32xbf16>, vector<32x32xbf16>, vector<2x32xf32> -> vector<2x32xf32>
    %17 = arith.addf %16, %12 : vector<2x32xf32>
    %18 = vector.broadcast %2 : vector<1x32xf32> to vector<2x32xf32>
    %19 = arith.addf %17, %18 : vector<2x32xf32>
    %cst_14 = arith.constant 0.000000e+00 : f32
    %20 = vector.broadcast %cst_14 : f32 to vector<2x32xf32>
    %21 = arith.maximumf %15, %20 : vector<2x32xf32>
    %cst_15 = arith.constant 0.000000e+00 : f32
    %22 = vector.broadcast %cst_15 : f32 to vector<2x32xf32>
    %23 = arith.maximumf %19, %22 : vector<2x32xf32>
    %24 = arith.truncf %21 : vector<2x32xf32> to vector<2x32xbf16>
    %25 = arith.truncf %23 : vector<2x32xf32> to vector<2x32xbf16>
    %c0_16 = arith.constant 0 : index
    %c0_17 = arith.constant 0 : index
    %26 = vector.load %arg5[%c0_16, %c0_17] : memref<1x32xf32, #tpu.memory_space<vmem>>, vector<1x32xf32>
    %c0_18 = arith.constant 0 : index
    %c0_19 = arith.constant 0 : index
    %c0_20 = arith.constant 0 : index
    %27 = vector.load %arg4[%c0_18, %c0_19, %c0_20] : memref<3x32x32xbf16, #tpu.memory_space<vmem>>, vector<1x32x32xbf16>
    %28 = vector.shape_cast %27 : vector<1x32x32xbf16> to vector<32x32xbf16>
    %c1_21 = arith.constant 1 : index
    %c0_22 = arith.constant 0 : index
    %c0_23 = arith.constant 0 : index
    %29 = vector.load %arg4[%c1_21, %c0_22, %c0_23] : memref<3x32x32xbf16, #tpu.memory_space<vmem>>, vector<1x32x32xbf16>
    %30 = vector.shape_cast %29 : vector<1x32x32xbf16> to vector<32x32xbf16>
    %c2_24 = arith.constant 2 : index
    %c0_25 = arith.constant 0 : index
    %c0_26 = arith.constant 0 : index
    %31 = vector.load %arg4[%c2_24, %c0_25, %c0_26] : memref<3x32x32xbf16, #tpu.memory_space<vmem>>, vector<1x32x32xbf16>
    %32 = vector.shape_cast %31 : vector<1x32x32xbf16> to vector<32x32xbf16>
    %cst_27 = arith.constant dense<0.000000e+00> : vector<2x32xf32>
    %33 = tpu.matmul %24, %28, %cst_27 {dimension_numbers = #tpu.dot_dimension_numbers<[1], [0], [0], [1], [0, 0, 1, 1], [], []>} : vector<2x32xbf16>, vector<32x32xbf16>, vector<2x32xf32> -> vector<2x32xf32>
    %cst_28 = arith.constant dense<0.000000e+00> : vector<2x32xf32>
    %34 = tpu.matmul %25, %28, %cst_28 {dimension_numbers = #tpu.dot_dimension_numbers<[1], [0], [0], [1], [0, 0, 1, 1], [], []>} : vector<2x32xbf16>, vector<32x32xbf16>, vector<2x32xf32> -> vector<2x32xf32>
    %35 = vector.extract_strided_slice %33 {offsets = [1, 0], sizes = [1, 32], strides = [1, 1]} : vector<2x32xf32> to vector<1x32xf32>
    %cst_29 = arith.constant 0.000000e+00 : f32
    %36 = vector.broadcast %cst_29 : f32 to vector<1x32xf32>
    %37 = tpu.concatenate %35, %36 in 0 : vector<1x32xf32>, vector<1x32xf32> -> vector<2x32xf32>
    %cst_30 = arith.constant dense<0.000000e+00> : vector<2x32xf32>
    %38 = tpu.matmul %24, %30, %cst_30 {dimension_numbers = #tpu.dot_dimension_numbers<[1], [0], [0], [1], [0, 0, 1, 1], [], []>} : vector<2x32xbf16>, vector<32x32xbf16>, vector<2x32xf32> -> vector<2x32xf32>
    %39 = vector.broadcast %26 : vector<1x32xf32> to vector<2x32xf32>
    %40 = arith.addf %38, %39 : vector<2x32xf32>
    %cst_31 = arith.constant dense<0.000000e+00> : vector<2x32xf32>
    %41 = tpu.matmul %24, %32, %cst_31 {dimension_numbers = #tpu.dot_dimension_numbers<[1], [0], [0], [1], [0, 0, 1, 1], [], []>} : vector<2x32xbf16>, vector<32x32xbf16>, vector<2x32xf32> -> vector<2x32xf32>
    %42 = arith.addf %41, %34 : vector<2x32xf32>
    %43 = vector.broadcast %26 : vector<1x32xf32> to vector<2x32xf32>
    %44 = arith.addf %42, %43 : vector<2x32xf32>
    %cst_32 = arith.constant 0.000000e+00 : f32
    %45 = vector.broadcast %cst_32 : f32 to vector<2x32xf32>
    %46 = arith.maximumf %40, %45 : vector<2x32xf32>
    %cst_33 = arith.constant 0.000000e+00 : f32
    %47 = vector.broadcast %cst_33 : f32 to vector<2x32xf32>
    %48 = arith.maximumf %44, %47 : vector<2x32xf32>
    %49 = arith.truncf %46 : vector<2x32xf32> to vector<2x32xbf16>
    %50 = arith.truncf %48 : vector<2x32xf32> to vector<2x32xbf16>
    %cst_34 = arith.constant dense<0.000000e+00> : vector<2x32xf32>
    %51 = tpu.matmul %25, %30, %cst_34 {dimension_numbers = #tpu.dot_dimension_numbers<[1], [0], [0], [1], [0, 0, 1, 1], [], []>} : vector<2x32xbf16>, vector<32x32xbf16>, vector<2x32xf32> -> vector<2x32xf32>
    %52 = vector.broadcast %26 : vector<1x32xf32> to vector<2x32xf32>
    %53 = arith.addf %51, %52 : vector<2x32xf32>
    %cst_35 = arith.constant dense<0.000000e+00> : vector<2x32xf32>
    %54 = tpu.matmul %25, %32, %cst_35 {dimension_numbers = #tpu.dot_dimension_numbers<[1], [0], [0], [1], [0, 0, 1, 1], [], []>} : vector<2x32xbf16>, vector<32x32xbf16>, vector<2x32xf32> -> vector<2x32xf32>
    %55 = arith.addf %54, %37 : vector<2x32xf32>
    %56 = vector.broadcast %26 : vector<1x32xf32> to vector<2x32xf32>
    %57 = arith.addf %55, %56 : vector<2x32xf32>
    %cst_36 = arith.constant 0.000000e+00 : f32
    %58 = vector.broadcast %cst_36 : f32 to vector<2x32xf32>
    %59 = arith.maximumf %53, %58 : vector<2x32xf32>
    %cst_37 = arith.constant 0.000000e+00 : f32
    %60 = vector.broadcast %cst_37 : f32 to vector<2x32xf32>
    %61 = arith.maximumf %57, %60 : vector<2x32xf32>
    %62 = arith.truncf %59 : vector<2x32xf32> to vector<2x32xbf16>
    %63 = arith.truncf %61 : vector<2x32xf32> to vector<2x32xbf16>
    %c0_38 = arith.constant 0 : index
    %c0_39 = arith.constant 0 : index
    %64 = vector.load %arg7[%c0_38, %c0_39] : memref<1x3xf32, #tpu.memory_space<vmem>>, vector<1x3xf32>
    %c0_40 = arith.constant 0 : index
    %c0_41 = arith.constant 0 : index
    %c0_42 = arith.constant 0 : index
    %65 = vector.load %arg6[%c0_40, %c0_41, %c0_42] : memref<3x32x3xbf16, #tpu.memory_space<vmem>>, vector<1x32x3xbf16>
    %66 = vector.shape_cast %65 : vector<1x32x3xbf16> to vector<32x3xbf16>
    %c1_43 = arith.constant 1 : index
    %c0_44 = arith.constant 0 : index
    %c0_45 = arith.constant 0 : index
    %67 = vector.load %arg6[%c1_43, %c0_44, %c0_45] : memref<3x32x3xbf16, #tpu.memory_space<vmem>>, vector<1x32x3xbf16>
    %68 = vector.shape_cast %67 : vector<1x32x3xbf16> to vector<32x3xbf16>
    %c2_46 = arith.constant 2 : index
    %c0_47 = arith.constant 0 : index
    %c0_48 = arith.constant 0 : index
    %69 = vector.load %arg6[%c2_46, %c0_47, %c0_48] : memref<3x32x3xbf16, #tpu.memory_space<vmem>>, vector<1x32x3xbf16>
    %70 = vector.shape_cast %69 : vector<1x32x3xbf16> to vector<32x3xbf16>
    %cst_49 = arith.constant dense<0.000000e+00> : vector<2x3xf32>
    %71 = tpu.matmul %49, %66, %cst_49 {dimension_numbers = #tpu.dot_dimension_numbers<[1], [0], [0], [1], [0, 0, 1, 1], [], []>} : vector<2x32xbf16>, vector<32x3xbf16>, vector<2x3xf32> -> vector<2x3xf32>
    %cst_50 = arith.constant dense<0.000000e+00> : vector<2x3xf32>
    %72 = tpu.matmul %50, %66, %cst_50 {dimension_numbers = #tpu.dot_dimension_numbers<[1], [0], [0], [1], [0, 0, 1, 1], [], []>} : vector<2x32xbf16>, vector<32x3xbf16>, vector<2x3xf32> -> vector<2x3xf32>
    %cst_51 = arith.constant dense<0.000000e+00> : vector<2x3xf32>
    %73 = tpu.matmul %62, %66, %cst_51 {dimension_numbers = #tpu.dot_dimension_numbers<[1], [0], [0], [1], [0, 0, 1, 1], [], []>} : vector<2x32xbf16>, vector<32x3xbf16>, vector<2x3xf32> -> vector<2x3xf32>
    %cst_52 = arith.constant dense<0.000000e+00> : vector<2x3xf32>
    %74 = tpu.matmul %63, %66, %cst_52 {dimension_numbers = #tpu.dot_dimension_numbers<[1], [0], [0], [1], [0, 0, 1, 1], [], []>} : vector<2x32xbf16>, vector<32x3xbf16>, vector<2x3xf32> -> vector<2x3xf32>
    %75 = vector.extract_strided_slice %71 {offsets = [1, 0], sizes = [1, 3], strides = [1, 1]} : vector<2x3xf32> to vector<1x3xf32>
    %cst_53 = arith.constant 0.000000e+00 : f32
    %76 = vector.broadcast %cst_53 : f32 to vector<1x3xf32>
    %77 = tpu.concatenate %75, %76 in 0 : vector<1x3xf32>, vector<1x3xf32> -> vector<2x3xf32>
    %cst_54 = arith.constant dense<0.000000e+00> : vector<2x3xf32>
    %78 = tpu.matmul %49, %68, %cst_54 {dimension_numbers = #tpu.dot_dimension_numbers<[1], [0], [0], [1], [0, 0, 1, 1], [], []>} : vector<2x32xbf16>, vector<32x3xbf16>, vector<2x3xf32> -> vector<2x3xf32>
    %79 = vector.broadcast %64 : vector<1x3xf32> to vector<2x3xf32>
    %80 = arith.addf %78, %79 : vector<2x3xf32>
    %cst_55 = arith.constant dense<0.000000e+00> : vector<2x3xf32>
    %81 = tpu.matmul %49, %70, %cst_55 {dimension_numbers = #tpu.dot_dimension_numbers<[1], [0], [0], [1], [0, 0, 1, 1], [], []>} : vector<2x32xbf16>, vector<32x3xbf16>, vector<2x3xf32> -> vector<2x3xf32>
    %82 = arith.addf %81, %72 : vector<2x3xf32>
    %83 = vector.broadcast %64 : vector<1x3xf32> to vector<2x3xf32>
    %84 = arith.addf %82, %83 : vector<2x3xf32>
    %cst_56 = arith.constant dense<0.000000e+00> : vector<2x3xf32>
    %85 = tpu.matmul %50, %68, %cst_56 {dimension_numbers = #tpu.dot_dimension_numbers<[1], [0], [0], [1], [0, 0, 1, 1], [], []>} : vector<2x32xbf16>, vector<32x3xbf16>, vector<2x3xf32> -> vector<2x3xf32>
    %86 = vector.broadcast %64 : vector<1x3xf32> to vector<2x3xf32>
    %87 = arith.addf %85, %86 : vector<2x3xf32>
    %cst_57 = arith.constant dense<0.000000e+00> : vector<2x3xf32>
    %88 = tpu.matmul %50, %70, %cst_57 {dimension_numbers = #tpu.dot_dimension_numbers<[1], [0], [0], [1], [0, 0, 1, 1], [], []>} : vector<2x32xbf16>, vector<32x3xbf16>, vector<2x3xf32> -> vector<2x3xf32>
    %89 = arith.addf %88, %73 : vector<2x3xf32>
    %90 = vector.broadcast %64 : vector<1x3xf32> to vector<2x3xf32>
    %91 = arith.addf %89, %90 : vector<2x3xf32>
    %cst_58 = arith.constant dense<0.000000e+00> : vector<2x3xf32>
    %92 = tpu.matmul %62, %68, %cst_58 {dimension_numbers = #tpu.dot_dimension_numbers<[1], [0], [0], [1], [0, 0, 1, 1], [], []>} : vector<2x32xbf16>, vector<32x3xbf16>, vector<2x3xf32> -> vector<2x3xf32>
    %93 = vector.broadcast %64 : vector<1x3xf32> to vector<2x3xf32>
    %94 = arith.addf %92, %93 : vector<2x3xf32>
    %cst_59 = arith.constant dense<0.000000e+00> : vector<2x3xf32>
    %95 = tpu.matmul %62, %70, %cst_59 {dimension_numbers = #tpu.dot_dimension_numbers<[1], [0], [0], [1], [0, 0, 1, 1], [], []>} : vector<2x32xbf16>, vector<32x3xbf16>, vector<2x3xf32> -> vector<2x3xf32>
    %96 = arith.addf %95, %74 : vector<2x3xf32>
    %97 = vector.broadcast %64 : vector<1x3xf32> to vector<2x3xf32>
    %98 = arith.addf %96, %97 : vector<2x3xf32>
    %cst_60 = arith.constant dense<0.000000e+00> : vector<2x3xf32>
    %99 = tpu.matmul %63, %68, %cst_60 {dimension_numbers = #tpu.dot_dimension_numbers<[1], [0], [0], [1], [0, 0, 1, 1], [], []>} : vector<2x32xbf16>, vector<32x3xbf16>, vector<2x3xf32> -> vector<2x3xf32>
    %100 = vector.broadcast %64 : vector<1x3xf32> to vector<2x3xf32>
    %101 = arith.addf %99, %100 : vector<2x3xf32>
    %cst_61 = arith.constant dense<0.000000e+00> : vector<2x3xf32>
    %102 = tpu.matmul %63, %70, %cst_61 {dimension_numbers = #tpu.dot_dimension_numbers<[1], [0], [0], [1], [0, 0, 1, 1], [], []>} : vector<2x32xbf16>, vector<32x3xbf16>, vector<2x3xf32> -> vector<2x3xf32>
    %103 = arith.addf %102, %77 : vector<2x3xf32>
    %104 = vector.broadcast %64 : vector<1x3xf32> to vector<2x3xf32>
    %105 = arith.addf %103, %104 : vector<2x3xf32>
    %c0_62 = arith.constant 0 : index
    %c0_63 = arith.constant 0 : index
    %c0_64 = arith.constant 0 : index
    %c0_65 = arith.constant 0 : index
    %106 = vector.load %arg8[%c0_62, %c0_63, %c0_64, %c0_65] : memref<1x8x2x3xf32, #tpu.memory_space<vmem>>, vector<1x1x2x3xf32>
    %107 = vector.shape_cast %106 : vector<1x1x2x3xf32> to vector<2x3xf32>
    %108 = vector.shape_cast %80 : vector<2x3xf32> to vector<1x1x2x3xf32>
    tpu.vector_store %arg8[%c0_62, %c0_63, %c0_64, %c0_65], %108 {strides = array<i32>} : memref<1x8x2x3xf32, #tpu.memory_space<vmem>>, vector<1x1x2x3xf32>,
    %c0_66 = arith.constant 0 : index
    %c1_67 = arith.constant 1 : index
    %c0_68 = arith.constant 0 : index
    %c0_69 = arith.constant 0 : index
    %109 = vector.load %arg8[%c0_66, %c1_67, %c0_68, %c0_69] : memref<1x8x2x3xf32, #tpu.memory_space<vmem>>, vector<1x1x2x3xf32>
    %110 = vector.shape_cast %109 : vector<1x1x2x3xf32> to vector<2x3xf32>
    %111 = vector.shape_cast %84 : vector<2x3xf32> to vector<1x1x2x3xf32>
    tpu.vector_store %arg8[%c0_66, %c1_67, %c0_68, %c0_69], %111 {strides = array<i32>} : memref<1x8x2x3xf32, #tpu.memory_space<vmem>>, vector<1x1x2x3xf32>,
    %c0_70 = arith.constant 0 : index
    %c2_71 = arith.constant 2 : index
    %c0_72 = arith.constant 0 : index
    %c0_73 = arith.constant 0 : index
    %112 = vector.load %arg8[%c0_70, %c2_71, %c0_72, %c0_73] : memref<1x8x2x3xf32, #tpu.memory_space<vmem>>, vector<1x1x2x3xf32>
    %113 = vector.shape_cast %112 : vector<1x1x2x3xf32> to vector<2x3xf32>
    %114 = vector.shape_cast %87 : vector<2x3xf32> to vector<1x1x2x3xf32>
    tpu.vector_store %arg8[%c0_70, %c2_71, %c0_72, %c0_73], %114 {strides = array<i32>} : memref<1x8x2x3xf32, #tpu.memory_space<vmem>>, vector<1x1x2x3xf32>,
    %c0_74 = arith.constant 0 : index
    %c3 = arith.constant 3 : index
    %c0_75 = arith.constant 0 : index
    %c0_76 = arith.constant 0 : index
    %115 = vector.load %arg8[%c0_74, %c3, %c0_75, %c0_76] : memref<1x8x2x3xf32, #tpu.memory_space<vmem>>, vector<1x1x2x3xf32>
    %116 = vector.shape_cast %115 : vector<1x1x2x3xf32> to vector<2x3xf32>
    %117 = vector.shape_cast %91 : vector<2x3xf32> to vector<1x1x2x3xf32>
    tpu.vector_store %arg8[%c0_74, %c3, %c0_75, %c0_76], %117 {strides = array<i32>} : memref<1x8x2x3xf32, #tpu.memory_space<vmem>>, vector<1x1x2x3xf32>,
    %c0_77 = arith.constant 0 : index
    %c4 = arith.constant 4 : index
    %c0_78 = arith.constant 0 : index
    %c0_79 = arith.constant 0 : index
    %118 = vector.load %arg8[%c0_77, %c4, %c0_78, %c0_79] : memref<1x8x2x3xf32, #tpu.memory_space<vmem>>, vector<1x1x2x3xf32>
    %119 = vector.shape_cast %118 : vector<1x1x2x3xf32> to vector<2x3xf32>
    %120 = vector.shape_cast %94 : vector<2x3xf32> to vector<1x1x2x3xf32>
    tpu.vector_store %arg8[%c0_77, %c4, %c0_78, %c0_79], %120 {strides = array<i32>} : memref<1x8x2x3xf32, #tpu.memory_space<vmem>>, vector<1x1x2x3xf32>,
    %c0_80 = arith.constant 0 : index
    %c5 = arith.constant 5 : index
    %c0_81 = arith.constant 0 : index
    %c0_82 = arith.constant 0 : index
    %121 = vector.load %arg8[%c0_80, %c5, %c0_81, %c0_82] : memref<1x8x2x3xf32, #tpu.memory_space<vmem>>, vector<1x1x2x3xf32>
    %122 = vector.shape_cast %121 : vector<1x1x2x3xf32> to vector<2x3xf32>
    %123 = vector.shape_cast %98 : vector<2x3xf32> to vector<1x1x2x3xf32>
    tpu.vector_store %arg8[%c0_80, %c5, %c0_81, %c0_82], %123 {strides = array<i32>} : memref<1x8x2x3xf32, #tpu.memory_space<vmem>>, vector<1x1x2x3xf32>,
    %c0_83 = arith.constant 0 : index
    %c6 = arith.constant 6 : index
    %c0_84 = arith.constant 0 : index
    %c0_85 = arith.constant 0 : index
    %124 = vector.load %arg8[%c0_83, %c6, %c0_84, %c0_85] : memref<1x8x2x3xf32, #tpu.memory_space<vmem>>, vector<1x1x2x3xf32>
    %125 = vector.shape_cast %124 : vector<1x1x2x3xf32> to vector<2x3xf32>
    %126 = vector.shape_cast %101 : vector<2x3xf32> to vector<1x1x2x3xf32>
    tpu.vector_store %arg8[%c0_83, %c6, %c0_84, %c0_85], %126 {strides = array<i32>} : memref<1x8x2x3xf32, #tpu.memory_space<vmem>>, vector<1x1x2x3xf32>,
    %c0_86 = arith.constant 0 : index
    %c7 = arith.constant 7 : index
    %c0_87 = arith.constant 0 : index
    %c0_88 = arith.constant 0 : index
    %127 = vector.load %arg8[%c0_86, %c7, %c0_87, %c0_88] : memref<1x8x2x3xf32, #tpu.memory_space<vmem>>, vector<1x1x2x3xf32>
    %128 = vector.shape_cast %127 : vector<1x1x2x3xf32> to vector<2x3xf32>
    %129 = vector.shape_cast %105 : vector<2x3xf32> to vector<1x1x2x3xf32>
    tpu.vector_store %arg8[%c0_86, %c7, %c0_87, %c0_88], %129 {strides = array<i32>} : memref<1x8x2x3xf32, #tpu.memory_space<vmem>>, vector<1x1x2x3xf32>,
    return
  }
  func.func @transform_0(%arg0: i32) -> (i32, i32, i32) {
    %c0_i32 = arith.constant 0 : i32
    %c0_i32_0 = arith.constant 0 : i32
    %c0_i32_1 = arith.constant 0 : i32
    return %arg0, %c0_i32, %c0_i32_0 : i32, i32, i32
  }
  func.func @transform_1(%arg0: i32) -> (i32, i32, i32) {
    %c0_i32 = arith.constant 0 : i32
    %c0_i32_0 = arith.constant 0 : i32
    %c0_i32_1 = arith.constant 0 : i32
    %c0_i32_2 = arith.constant 0 : i32
    return %c0_i32, %c0_i32_0, %c0_i32_1 : i32, i32, i32
  }
  func.func @transform_2(%arg0: i32) -> (i32, i32) {
    %c0_i32 = arith.constant 0 : i32
    %c0_i32_0 = arith.constant 0 : i32
    %c0_i32_1 = arith.constant 0 : i32
    return %c0_i32, %c0_i32_0 : i32, i32
  }
  func.func @transform_3(%arg0: i32) -> (i32, i32, i32) {
    %c0_i32 = arith.constant 0 : i32
    %c0_i32_0 = arith.constant 0 : i32
    %c0_i32_1 = arith.constant 0 : i32
    %c0_i32_2 = arith.constant 0 : i32
    return %c0_i32, %c0_i32_0, %c0_i32_1 : i32, i32, i32
  }
  func.func @transform_4(%arg0: i32) -> (i32, i32) {
    %c0_i32 = arith.constant 0 : i32
    %c0_i32_0 = arith.constant 0 : i32
    %c0_i32_1 = arith.constant 0 : i32
    return %c0_i32, %c0_i32_0 : i32, i32
  }
  func.func @transform_5(%arg0: i32) -> (i32, i32, i32) {
    %c0_i32 = arith.constant 0 : i32
    %c0_i32_0 = arith.constant 0 : i32
    %c0_i32_1 = arith.constant 0 : i32
    %c0_i32_2 = arith.constant 0 : i32
    return %c0_i32, %c0_i32_0, %c0_i32_1 : i32, i32, i32
  }
  func.func @transform_6(%arg0: i32) -> (i32, i32) {
    %c0_i32 = arith.constant 0 : i32
    %c0_i32_0 = arith.constant 0 : i32
    %c0_i32_1 = arith.constant 0 : i32
    return %c0_i32, %c0_i32_0 : i32, i32
  }
  func.func @transform_7(%arg0: i32) -> (i32, i32, i32, i32) {
    %c0_i32 = arith.constant 0 : i32
    %c0_i32_0 = arith.constant 0 : i32
    %c0_i32_1 = arith.constant 0 : i32
    %c0_i32_2 = arith.constant 0 : i32
    return %arg0, %c0_i32, %c0_i32_0, %c0_i32_1 : i32, i32, i32, i32
  }
}

</mosaic_0001>

<bundles_post_ra>
// kernel: conv_vae_forward.4
= control target key start
LH: loop header
LB: loop body
LE: loop exit
PB: predicated region body
PF: predicated region fallthrough
CT: control target
= control target key end

     0   :  { %15 = vsyncpa [#allocation3], 0  ;;  %s406_s0 = inlined_call_operand.vmem [shape: bf16[2,64], index: 0, kind: input, shape index: {}]   ;;  %s407_s1 = inlined_call_operand.vmem [shape: bf16[64,8], index: 1, kind: input, shape index: {}]   ;;  %s408_s2 = inlined_call_operand.vmem [shape: f32[1,8], index: 2, kind: input, shape index: {}]   ;;  %s409_s3 = inlined_call_operand.vmem [shape: bf16[64,8], index: 3, kind: input, shape index: {}]   ;;  %s410_s4 = inlined_call_operand.vmem [shape: f32[1,8], index: 4, kind: input, shape index: {}]   ;;  %s411_s5 = inlined_call_operand.vmem [shape: bf16[8,64], index: 5, kind: input, shape index: {}]   ;;  %s412_s6 = inlined_call_operand.vmem [shape: f32[1,64], index: 6, kind: input, shape index: {}]   ;;  %s413_s7 = inlined_call_operand.hbm [shape: f32[2,8], index: 7, kind: output, shape index: {0}]   ;;  %s414_s8 = inlined_call_operand.hbm [shape: f32[2,8], index: 8, kind: output, shape index: {1}]   ;;  %s415_s9 = inlined_call_operand.vmem [shape: bf16[2,64], index: 9, kind: output, shape index: {2}]  }
   0x1   :  { %v242_v0 = vld [vmem:[%s407_s1 + $0x18] sm:$0xff]  ;;  %v241_v2 = vld [vmem:[%s407_s1 + $0x10] sm:$0xff] }
   0x2   :  { %v246_v1 = vld [vmem:[%s409_s3 + $0x18] sm:$0xff]  ;;  %77 = vmatpush.bf16.msra.mxu0 %v242_v0  ;;  %v245_v3 = vld [vmem:[%s409_s3 + $0x10] sm:$0xff] }
   0x3   :  { %126 = vmatpush.bf16.msra.mxu1 %v246_v1 }
   0x4   :  { %16 = vsyncpa [#allocation5], 0  ;;  %v240_v4 = vld [vmem:[%s407_s1 + $0x8] sm:$0xff]  ;;  %v239_v6 = vld [vmem:[%s407_s1] sm:$0xff]  ;;  %vm69_vm0 = vcmask 523264   ;;  %vm145_vm1 = vcmask 1043456  }
   0x5   :  { %v244_v5 = vld [vmem:[%s409_s3 + $0x8] sm:$0xff]  ;;  %v32_v7 = vld [vmem:[%s406_s0] sm:$0x1]  ;;  %vm162_vm2 = vcmask 58368   ;;  %vm141_vm3 = vcmask 64512   ;;  %s304_s0 = smov [#allocation2]  }
   0x6   :  { %78 = vmatpush.bf16.msra.mxu0 %v241_v2  ;;  %v243_v8 = vld [vmem:[%s409_s3] sm:$0xff]  ;;  %s173_s3 = sshll.u32 %s304_s0, 4  ;;  %s175_s10 = sshll.u32 %s413_s7, 4  ;;  %vm166_vm4 = vcmask 516096   ;;  %s174_s3 = int_to_ptr.vmem [resolvable:$true] %s173_s3  ;;  %s176_s10 = int_to_ptr.hbm [resolvable:$true] %s175_s10 }
   0x7   :  { %127 = vmatpush.bf16.msra.mxu1 %v245_v3  ;;  %v136_v9 = vld [vmem:[%s411_s5] sm:$0xf]  ;;  %s305_s12 = smov [#allocation4]   ;;  %s186_s16 = sshll.u32 %s414_s8, 4  ;;  %s187_s16 = int_to_ptr.hbm [resolvable:$true] %s186_s16 }
   0x8   :  { %v147_v10 = vsel %vm145_vm1, %v136_v9, 0  ;;  %v249_v11 = vld [vmem:[%s408_s2] ss:$0 sm:$0xff]  ;;  %s184_s13 = sshll.u32 %s305_s12, 4  ;;  %s185_s13 = int_to_ptr.vmem [resolvable:$true] %s184_s13 }
   0x9   :  { %156 = vmatpush.bf16.msra.mxu2 %v147_v10  ;;  %v250_v16 = vld [vmem:[%s410_s4] ss:$0 sm:$0xff] }
   0xa   :  { %79 = vmatpush.bf16.msra.mxu0 %v240_v4  ;;  %v251_v20 = vld [vmem:[%s412_s6] ss:$0 sm:$0xff] }
   0xb   :  { %128 = vmatpush.bf16.msra.mxu1 %v244_v5 }
   0xe   :  { %80 = vmatpush.bf16.msra.mxu0 %v239_v6 }
   0xf   :  { %129 = vmatpush.bf16.msra.mxu1 %v243_v8 }
  0x11   :  { %220 = vmatmul.msk.bf16.vlgmr.msra.gmra.mxu0 %vm69_vm0, %v32_v7 }
  0x12   :  { %237 = vmatmul.msk.bf16.vlgmr.msra.gmra.mxu1 %vm69_vm0, %v32_v7 }
  0x8e   :  { %v82_v12 = vpop.f32.mrf.mxu0 }
  0x8f   :  { %v83_v13 = vadd.f32 %v249_v11, %v82_v12  ;;  %v131_v17 = vpop.f32.mrf.mxu1 }
  0x90   :  { %v132_v18 = vadd.f32 %v250_v16, %v131_v17 }
  0x91   :  { %v135_v14 = vpack.c.bf16 %v83_v13, %v83_v13  ;;  %163 = vst.msk [vmem:[#allocation2] sm:$0x3] %vm162_vm2, %v83_v13 }
  0x92   :  { %178 = dma.vmem_to_hbm [thread:$0]  %s174_s3, 32, %s176_s10, [#allocation3]   ;;  %164 = vst.msk [vmem:[#allocation4] sm:$0x3] %vm162_vm2, %v132_v18 }
  0x93   :  { %238 = vmatmul.msk.bf16.vlgmr.msra.gmra.mxu2 %vm141_vm3, %v135_v14  ;;  %189 = dma.vmem_to_hbm [thread:$0]  %s185_s13, 32, %s187_s16, [#allocation5]  }
  0x96   :  { %v84_v15 = vpop.f32.mrf.mxu0 }
  0x97   :  { %v133_v19 = vpop.f32.mrf.mxu1 }
 0x116   :  { %v158_v21 = vpop.f32.mrf.mxu2 }
 0x117   :  { %v159_v22 = vadd.f32 %v251_v20, %v158_v21 }
 0x119   :  { %v165_v23 = vpack.c.bf16 %v159_v22, %v159_v22 }
 0x11b   :  { %167 = vst.msk [vmem:[%s415_s9] sm:$0x1] %vm166_vm4, %v165_v23 }
 0x11e   :  { %v160_v24 = vpop.f32.mrf.mxu2 }
 0x11f   :  { %300 = dma.done.wait [#allocation3], 32  }
 0x120   :  { %301 = vsyncadd [#allocation3], 4294967264 }
 0x121   :  { %302 = dma.done.wait [#allocation5], 32  }
 0x122   :  { %303 = vsyncadd [#allocation5], 4294967264 }
 0x123   :  { %202 = vsyncpa [#allocation3], 1 }
 0x124   :  { %203 = vsyncpa [#allocation5], 1 }

// kernel: conv_vae_forward.5
= control target key start
LH: loop header
LB: loop body
LE: loop exit
PB: predicated region body
PF: predicated region fallthrough
CT: control target
= control target key end

     0   :  { %s1043_s24 = smov 0   ;;  %s1169_s0 = inlined_call_operand.vmem [shape: bf16[2,2,32], index: 0, kind: input, shape index: {}]   ;;  %s1170_s1 = inlined_call_operand.vmem [shape: bf16[3,32,32], index: 1, kind: input, shape index: {}]   ;;  %s1171_s2 = inlined_call_operand.vmem [shape: f32[1,32], index: 2, kind: input, shape index: {}]   ;;  %s1172_s3 = inlined_call_operand.vmem [shape: bf16[3,32,32], index: 3, kind: input, shape index: {}]   ;;  %s1173_s4 = inlined_call_operand.vmem [shape: f32[1,32], index: 4, kind: input, shape index: {}]   ;;  %s1174_s5 = inlined_call_operand.vmem [shape: bf16[3,32,3], index: 5, kind: input, shape index: {}]   ;;  %s1175_s6 = inlined_call_operand.vmem [shape: f32[1,3], index: 6, kind: input, shape index: {}]   ;;  %s1176_s7 = inlined_call_operand.vmem [shape: f32[2,8,2,3], index: 7, kind: output, shape index: {}]  }
   0x1 LB: > { %s832_s25 = sadd.s32 4294967295, %s1001_s24   ;;  %p836_p0 = scmp.ge.s32.totalorder %s1001_s24, 1  ;;  %s1001_s24 = sphi %s1043_s24, %s17_s24  }
   0x2   : > { %p235_p1 = scmp.lt.s32.totalorder %s1001_s24, 3 }
   0x4   : > { %p236_p2 = pnand %p836_p0, %p235_p1 }
   0x5   : > { %p265_p3 = scmp.lt.s32.totalorder (!%p236_p2), %s832_s25, 1 }
   0x6   : > { %239 = sbr.rel (%p236_p2) target bundleno = 477 (0x1dd), region = 48 }
   0xb   : > { %v967_v0 = vld [vmem:[%s1170_s1 + $0x8] sm:$0xff]  ;;  %v969_v1 = vld [vmem:[%s1170_s1 + $0x18] sm:$0xff]  ;;  %v966_v3 = vld [vmem:[%s1170_s1] sm:$0xff]  ;;  %s1178_s25 = smov (!%p265_p3, %s832_s25), 1  ;;  %vm302_vm0 = vcmask 261120   ;;  %vm322_vm1 = vcmask 1040384  }
   0xc   : > { %v971_v2 = vld [vmem:[%s1170_s1 + $0x28] sm:$0xff]  ;;  %312 = vmatpush.bf16.msra.mxu0 %v967_v0  ;;  %345 = vmatpush.bf16.msra.mxu1 %v969_v1  ;;  %v968_v4 = vld [vmem:[%s1170_s1 + $0x10] sm:$0xff]  ;;  %v970_v5 = vld [vmem:[%s1170_s1 + $0x20] sm:$0xff]  ;;  %s267_s17 = scalar_lea.vmem %s1169_s0, %s1178_s25  ;;  %s965_s27 = sshll.u32 %s1178_s25, 4  ;;  %vm764_vm2 = vcmask 17408  }
   0xd   : > { %370 = vmatpush.bf16.msra.mxu2 %v971_v2  ;;  %v274_v6 = vld [vmem:[%s267_s17] sm:$0x1]  ;;  %v973_v7 = vld [vmem:[%s1172_s3 + $0x8] sm:$0xff]  ;;  %v975_v8 = vld [vmem:[%s1172_s3 + $0x18] sm:$0xff]  ;;  %s1147_s9 = scalar_lea.vmem %s1176_s7, %s965_s27 }
   0xe   : > { %v977_v9 = vld [vmem:[%s1172_s3 + $0x28] sm:$0xff]  ;;  %418 = vmatpush.bf16.msra.mxu3 %v973_v7  ;;  %v972_v10 = vld [vmem:[%s1172_s3] sm:$0xff]  ;;  %v974_v11 = vld [vmem:[%s1172_s3 + $0x10] sm:$0xff] }
   0xf   : > { %v976_v12 = vld [vmem:[%s1172_s3 + $0x20] sm:$0xff]  ;;  %v979_v29 = vld [vmem:[%s1174_s5 + $0x8] sm:$0xff]  ;;  %v981_v31 = vld [vmem:[%s1174_s5 + $0x18] sm:$0xff] }
  0x10   : > { %313 = vmatpush.bf16.msra.mxu0 %v966_v3  ;;  %346 = vmatpush.bf16.msra.mxu1 %v968_v4  ;;  %v992_v13 = vld [vmem:[%s1171_s2] ss:$0 sm:$0xff]  ;;  %v980_v32 = vld [vmem:[%s1174_s5 + $0x10] sm:$0xff]  ;;  %v983_v33 = vld [vmem:[%s1174_s5 + $0x28] sm:$0xff] }
  0x11   : > { %371 = vmatpush.bf16.msra.mxu2 %v970_v5  ;;  %v978_v30 = vld [vmem:[%s1174_s5] sm:$0xff] }
  0x12   : > { %419 = vmatpush.bf16.msra.mxu3 %v972_v10  ;;  %v993_v34 = vld [vmem:[%s1173_s4] ss:$0 sm:$0xff] }
  0x13   : > { %855 = vmatmul.msk.bf16.vlgmr.msra.gmra.mxu0 %vm302_vm0, %v274_v6  ;;  %864 = vmatmul.msk.bf16.vlgmr.msra.gmra.mxu1 %vm302_vm0, %v274_v6  ;;  %v982_v35 = vld [vmem:[%s1174_s5 + $0x20] sm:$0xff] }
  0x14   : > { %873 = vmatmul.msk.bf16.vlgmr.msra.gmra.mxu2 %vm302_vm0, %v274_v6  ;;  %466 = vmatpush.bf16.msrb.mxu1 %v975_v8  ;;  %v994_v2 = vld [vmem:[%s1175_s6] ss:$0 sm:$0xff] }
  0x15   : > { %491 = vmatpush.bf16.msrb.mxu2 %v977_v9  ;;  %434 = vmatpush.bf16.msrb.mxu0 %v973_v7 }
  0x16   : > { %509 = vmatpush.bf16.msrb.mxu3 %v975_v8 }
  0x18   : > { %467 = vmatpush.bf16.msrb.mxu1 %v974_v11 }
  0x19   : > { %492 = vmatpush.bf16.msrb.mxu2 %v976_v12  ;;  %435 = vmatpush.bf16.msrb.mxu0 %v972_v10 }
  0x1a   : > { %510 = vmatpush.bf16.msrb.mxu3 %v974_v11 }
  0x1c   : > { %570 = vmatpush.bf16.msra.mxu1 %v979_v29 }
  0x1d   : > { %522 = vmatpush.bf16.msra.mxu0 %v977_v9  ;;  %586 = vmatpush.bf16.msra.mxu2 %v979_v29 }
  0x20   : > { %571 = vmatpush.bf16.msra.mxu1 %v978_v30 }
  0x21   : > { %523 = vmatpush.bf16.msra.mxu0 %v976_v12  ;;  %587 = vmatpush.bf16.msra.mxu2 %v978_v30 }
  0x90   : > { %v315_v14 = vpop.f32.mrf.mxu0  ;;  %v348_v15 = vpop.f32.mrf.mxu1 }
  0x91   : > { %v320_v16 = vrot.slane %v315_v14, 1  ;;  %v349_v17 = vadd.f32 %v992_v13, %v348_v15 }
  0x93   : > { %v378_v18 = vmax.f32 %v349_v17, 0.0  ;;  %v323_v20 = vsel %vm322_vm1, %v320_v16, 0.0 }
  0x95   : > { %v380_v19 = vpack.c.bf16 %v378_v18, %v378_v18 }
  0x97   : > { %v373_v21 = vpop.f32.mrf.mxu2  ;;  %890 = vmatmul.msk.bf16.vlgmr.msra.gmra.mxu3 %vm302_vm0, %v380_v19  ;;  %900 = vmatmul.msk.bf16.vlgmr.msrb.gmra.mxu1 %vm302_vm0, %v380_v19 }
  0x98   : > { %v374_v22 = vadd.f32 %v373_v21, %v323_v20  ;;  %909 = vmatmul.msk.bf16.vlgmr.msrb.gmra.mxu2 %vm302_vm0, %v380_v19  ;;  %v317_v23 = vpop.f32.mrf.mxu0  ;;  %v350_v24 = vpop.f32.mrf.mxu1  ;;  %602 = vmatpush.bf16.msra.mxu3 %v979_v29 }
  0x99   : > { %650 = vmatpush.bf16.msrb.mxu1 %v981_v31  ;;  %675 = vmatpush.bf16.msrb.mxu2 %v983_v33 }
  0x9a   : > { %v377_v25 = vadd.f32 %v992_v13, %v374_v22 }
  0x9c   : > { %v379_v26 = vmax.f32 %v377_v25, 0.0  ;;  %603 = vmatpush.bf16.msra.mxu3 %v978_v30 }
  0x9d   : > { %651 = vmatpush.bf16.msrb.mxu1 %v980_v32  ;;  %676 = vmatpush.bf16.msrb.mxu2 %v982_v35 }
  0x9e   : > { %v381_v27 = vpack.c.bf16 %v379_v26, %v379_v26 }
  0x9f   : > { %v375_v28 = vpop.f32.mrf.mxu2 }
  0xa0   : > { %891 = vmatmul.msk.bf16.vlgmr.msrb.gmra.mxu0 %vm302_vm0, %v381_v27 }
  0xa1   : > { %618 = vmatpush.bf16.msrb.mxu0 %v979_v29 }
  0xa5   : > { %619 = vmatpush.bf16.msrb.mxu0 %v978_v30 }
  0xa7   : > { %910 = vmatmul.msk.bf16.vlgmr.msrb.gmra.mxu3 %vm302_vm0, %v381_v27 }
  0xa8   : > { %689 = vmatpush.bf16.msrb.mxu3 %v981_v31 }
  0xac   : > { %690 = vmatpush.bf16.msrb.mxu3 %v980_v32 }
  0xb0   : > { %911 = vmatmul.msk.bf16.vlgmr.msra.gmra.mxu0 %vm302_vm0, %v381_v27 }
  0xb1   : > { %702 = vmatpush.bf16.msra.mxu0 %v983_v33 }
  0xb5   : > { %703 = vmatpush.bf16.msra.mxu0 %v982_v35 }
 0x114   : > { %v469_v36 = vpop.f32.mrf.mxu1 }
 0x115   : > { %v470_v37 = vadd.f32 %v993_v34, %v469_v36 }
 0x117   : > { %v499_v38 = vmax.f32 %v470_v37, 0.0 }
 0x119   : > { %v501_v39 = vpack.c.bf16 %v499_v38, %v499_v38 }
 0x11a   : > { %v421_v40 = vpop.f32.mrf.mxu3 }
 0x11b   : > { %v494_v41 = vpop.f32.mrf.mxu2  ;;  %928 = vmatmul.msk.bf16.vlgmr.msra.gmra.mxu1 %vm302_vm0, %v501_v39  ;;  %v442_v51 = vrot.slane %v421_v40, 1 }
 0x11c   : > { %v471_v42 = vpop.f32.mrf.mxu1  ;;  %716 = vmatpush.bf16.msra.mxu1 %v981_v31 }
 0x11d   : > { %v437_v43 = vpop.f32.mrf.mxu0  ;;  %v444_v55 = vsel %vm322_vm1, %v442_v51, 0.0 }
 0x11e   : > { %v495_v44 = vadd.f32 %v494_v41, %v437_v43 }
 0x120   : > { %v498_v45 = vadd.f32 %v993_v34, %v495_v44  ;;  %717 = vmatpush.bf16.msra.mxu1 %v980_v32 }
 0x122   : > { %v500_v46 = vmax.f32 %v498_v45, 0.0  ;;  %v423_v47 = vpop.f32.mrf.mxu3 }
 0x123   : > { %v496_v48 = vpop.f32.mrf.mxu2 }
 0x124   : > { %v502_v49 = vpack.c.bf16 %v500_v46, %v500_v46 }
 0x125   : > { %v439_v50 = vpop.f32.mrf.mxu0 }
 0x126   : > { %929 = vmatmul.msk.bf16.vlgmr.msra.gmra.mxu2 %vm302_vm0, %v502_v49 }
 0x127   : > { %729 = vmatpush.bf16.msra.mxu2 %v983_v33 }
 0x12a   : > { %v512_v52 = vpop.f32.mrf.mxu3 }
 0x12b   : > { %v513_v53 = vadd.f32 %v993_v34, %v512_v52  ;;  %940 = vmatmul.msk.bf16.vlgmr.msrb.gmra.mxu1 %vm302_vm0, %v501_v39  ;;  %730 = vmatpush.bf16.msra.mxu2 %v982_v35 }
 0x12d   : > { %v530_v54 = vmax.f32 %v513_v53, 0.0  ;;  %v525_v56 = vpop.f32.mrf.mxu0 }
 0x12e   : > { %v526_v57 = vadd.f32 %v525_v56, %v444_v55 }
 0x12f   : > { %v532_v58 = vpack.c.bf16 %v530_v54, %v530_v54 }
 0x130   : > { %v529_v59 = vadd.f32 %v993_v34, %v526_v57 }
 0x131   : > { %930 = vmatmul.msk.bf16.vlgmr.msra.gmra.mxu3 %vm302_vm0, %v532_v58 }
 0x132   : > { %v531_v60 = vmax.f32 %v529_v59, 0.0  ;;  %v514_v61 = vpop.f32.mrf.mxu3  ;;  %743 = vmatpush.bf16.msra.mxu3 %v981_v31 }
 0x134   : > { %v533_v62 = vpack.c.bf16 %v531_v60, %v531_v60 }
 0x135   : > { %v527_v63 = vpop.f32.mrf.mxu0 }
 0x136   : > { %931 = vmatmul.msk.bf16.vlgmr.msrb.gmra.mxu0 %vm302_vm0, %v533_v62  ;;  %949 = vmatmul.msk.bf16.vlgmr.msrb.gmra.mxu2 %vm302_vm0, %v501_v39 }
 0x137   : > { %756 = vmatpush.bf16.msrb.mxu0 %v983_v33  ;;  %744 = vmatpush.bf16.msra.mxu3 %v980_v32 }
 0x13b   : > { %952 = vmatmul.msk.bf16.vlgmr.msra.gmra.mxu1 %vm302_vm0, %v532_v58  ;;  %757 = vmatpush.bf16.msrb.mxu0 %v982_v35 }
 0x141   : > { %950 = vmatmul.msk.bf16.vlgmr.msrb.gmra.mxu3 %vm302_vm0, %v502_v49 }
 0x146   : > { %951 = vmatmul.msk.bf16.vlgmr.msra.gmra.mxu0 %vm302_vm0, %v502_v49  ;;  %953 = vmatmul.msk.bf16.vlgmr.msra.gmra.mxu2 %vm302_vm0, %v532_v58 }
 0x151   : > { %954 = vmatmul.msk.bf16.vlgmr.msra.gmra.mxu3 %vm302_vm0, %v533_v62 }
 0x156   : > { %955 = vmatmul.msk.bf16.vlgmr.msrb.gmra.mxu0 %vm302_vm0, %v533_v62 }
 0x198   : > { %v573_v0 = vpop.f32.mrf.mxu1 }
 0x199   : > { %v626_v29 = vrot.slane %v573_v0, 1 }
 0x19b   : > { %v628_v31 = vsel %vm322_vm1, %v626_v29, 0.0 }
 0x1a0   : > { %v575_v1 = vpop.f32.mrf.mxu1 }
 0x1a8   : > { %v653_v3 = vpop.f32.mrf.mxu1 }
 0x1a9   : > { %v589_v4 = vpop.f32.mrf.mxu2  ;;  %v654_v5 = vadd.f32 %v994_v2, %v653_v3 }
 0x1ab   : > { %765 = vst.msk [vmem:[%s1147_s9] sm:$0x3] %vm764_vm2, %v654_v5 }
 0x1b0   : > { %v655_v6 = vpop.f32.mrf.mxu1 }
 0x1b1   : > { %v591_v7 = vpop.f32.mrf.mxu2 }
 0x1b3   : > { %v621_v8 = vpop.f32.mrf.mxu0 }
 0x1b4   : > { %v605_v9 = vpop.f32.mrf.mxu3 }
 0x1b8   : > { %v719_v10 = vpop.f32.mrf.mxu1 }
 0x1b9   : > { %v678_v11 = vpop.f32.mrf.mxu2  ;;  %v720_v12 = vadd.f32 %v994_v2, %v719_v10 }
 0x1ba   : > { %v679_v13 = vadd.f32 %v678_v11, %v589_v4 }
 0x1bb   : > { %959 = vst.msk [vmem:[%s1147_s9 + $0x8] sm:$0x3] %vm764_vm2, %v720_v12  ;;  %v623_v14 = vpop.f32.mrf.mxu0 }
 0x1bc   : > { %v682_v15 = vadd.f32 %v994_v2, %v679_v13  ;;  %v607_v16 = vpop.f32.mrf.mxu3 }
 0x1be   : > { %956 = vst.msk [vmem:[%s1147_s9 + $0x2] sm:$0x3] %vm764_vm2, %v682_v15 }
 0x1c0   : > { %v721_v17 = vpop.f32.mrf.mxu1 }
 0x1c1   : > { %v680_v18 = vpop.f32.mrf.mxu2 }
 0x1c3   : > { %v705_v19 = vpop.f32.mrf.mxu0 }
 0x1c4   : > { %v706_v20 = vadd.f32 %v705_v19, %v605_v9  ;;  %v692_v21 = vpop.f32.mrf.mxu3 }
 0x1c5   : > { %v693_v22 = vadd.f32 %v994_v2, %v692_v21 }
 0x1c6   : > { %v709_v23 = vadd.f32 %v994_v2, %v706_v20 }
 0x1c7   : > { %957 = vst.msk [vmem:[%s1147_s9 + $0x4] sm:$0x3] %vm764_vm2, %v693_v22 }
 0x1c8   : > { %958 = vst.msk [vmem:[%s1147_s9 + $0x6] sm:$0x3] %vm764_vm2, %v709_v23 }
 0x1c9   : > { %v732_v24 = vpop.f32.mrf.mxu2 }
 0x1ca   : > { %v733_v25 = vadd.f32 %v732_v24, %v621_v8 }
 0x1cb   : > { %v707_v26 = vpop.f32.mrf.mxu0 }
 0x1cc   : > { %v736_v27 = vadd.f32 %v994_v2, %v733_v25  ;;  %v694_v28 = vpop.f32.mrf.mxu3 }
 0x1ce   : > { %960 = vst.msk [vmem:[%s1147_s9 + $0xa] sm:$0x3] %vm764_vm2, %v736_v27 }
 0x1d1   : > { %v734_v30 = vpop.f32.mrf.mxu2 }
 0x1d3   : > { %v759_v32 = vpop.f32.mrf.mxu0 }
 0x1d4   : > { %v760_v33 = vadd.f32 %v759_v32, %v628_v31  ;;  %v746_v34 = vpop.f32.mrf.mxu3 }
 0x1d5   : > { %v747_v35 = vadd.f32 %v994_v2, %v746_v34 }
 0x1d6   : > { %v763_v36 = vadd.f32 %v994_v2, %v760_v33 }
 0x1d7   : > { %961 = vst.msk [vmem:[%s1147_s9 + $0xc] sm:$0x3] %vm764_vm2, %v747_v35 }
 0x1d8   : > { %962 = vst.msk [vmem:[%s1147_s9 + $0xe] sm:$0x3] %vm764_vm2, %v763_v36 }
 0x1db   : > { %v761_v37 = vpop.f32.mrf.mxu0 }
 0x1dc   : > { %v748_v38 = vpop.f32.mrf.mxu3 }
 0x1dd PF: > { %s17_s24 = sadd.s32 1, %s1001_s24  }
 0x1de   : > { %p14_p4 = scmp.ge.s32.totalorder %s17_s24, 4  }
 0x1e0   :  { %16 = sbr.rel (!%p14_p4) target bundleno = 1 (0x1), region = 91 }

// kernel: conv_vae_forward.3
= control target key start
LH: loop header
LB: loop body
LE: loop exit
PB: predicated region body
PF: predicated region fallthrough
CT: control target
= control target key end

     0   :  { %s1002_s24 = smov 0   ;;  %s1102_s0 = inlined_call_operand.vmem [shape: bf16[2,8,2,3], index: 0, kind: input, shape index: {}]   ;;  %s1103_s1 = inlined_call_operand.vmem [shape: bf16[3,3,32], index: 1, kind: input, shape index: {}]   ;;  %s1104_s2 = inlined_call_operand.vmem [shape: f32[1,32], index: 2, kind: input, shape index: {}]   ;;  %s1105_s3 = inlined_call_operand.vmem [shape: bf16[3,32,32], index: 3, kind: input, shape index: {}]   ;;  %s1106_s4 = inlined_call_operand.vmem [shape: f32[1,32], index: 4, kind: input, shape index: {}]   ;;  %s1107_s5 = inlined_call_operand.vmem [shape: bf16[3,32,32], index: 5, kind: input, shape index: {}]   ;;  %s1108_s6 = inlined_call_operand.vmem [shape: f32[1,32], index: 6, kind: input, shape index: {}]   ;;  %s1109_s7 = inlined_call_operand.vmem [shape: bf16[2,2,32], index: 7, kind: output, shape index: {}]  }
   0x1 LB: > { %s827_s25 = sadd.s32 4294967295, %s959_s24   ;;  %p831_p0 = scmp.ge.s32.totalorder %s959_s24, 1  ;;  %s959_s24 = sphi %s1002_s24, %s17_s24  }
   0x2   : > { %p236_p1 = scmp.lt.s32.totalorder %s959_s24, 3 }
   0x4   : > { %p237_p2 = pnand %p831_p0, %p236_p1 }
   0x5   : > { %p265_p3 = scmp.lt.s32.totalorder (!%p237_p2), %s827_s25, 1 }
   0x6   : > { %240 = sbr.rel (%p237_p2) target bundleno = 492 (0x1ec), region = 48 }
   0xb   : > { %v289_v0 = vld [vmem:[%s1103_s1] sm:$0x3]  ;;  %vm298_vm0 = vcmask 1040384   ;;  %vm299_vm1 = vcmask 1041408   ;;  %v961_v1 = vmov 65535   ;;  %s1111_s25 = smov (!%p265_p3, %s827_s25), 1 }
   0xc   : > { %v300_v2 = vsel %vm298_vm0, 4294967295, %v961_v1  ;;  %v840_v3 = vld [vmem:[%s1103_s1 + $0x2] sm:$0x3]  ;;  %v841_v4 = vld [vmem:[%s1103_s1 + $0x4] sm:$0x3]  ;;  %s832_s9 = sshll.u32 %s1111_s25, 3  ;;  %s271_s26 = scalar_lea.vmem %s1109_s7, %s1111_s25 }
   0xd   : > { %v301_v5 = vsel %vm299_vm1, %v300_v2, 0  ;;  %s268_s12 = scalar_lea.vmem %s1102_s0, %s832_s9  ;;  %vm294_vm2 = vcmask 23552   ;;  %v932_v17 = vld [vmem:[%s1105_s3 + $0x18] sm:$0xff]  ;;  %v931_v18 = vld [vmem:[%s1105_s3 + $0x10] sm:$0xff]  ;;  %v934_v19 = vld [vmem:[%s1105_s3 + $0x28] sm:$0xff]  ;;  %vm539_vm3 = vcmask 261120  }
   0xe   : > { %v303_v6 = vand.u32 %v301_v5, %v289_v0  ;;  %v326_v7 = vand.u32 %v840_v3, %v301_v5  ;;  %v346_v8 = vand.u32 %v841_v4, %v301_v5  ;;  %v839_v9 = vld [vmem:[%s268_s12 + $0x7] sm:$0x1]  ;;  %v273_v10 = vld [vmem:[%s268_s12] sm:$0x1]  ;;  %v833_v11 = vld [vmem:[%s268_s12 + $0x1] sm:$0x1] }
   0xf   : > { %v834_v12 = vld [vmem:[%s268_s12 + $0x2] sm:$0x1]  ;;  %v835_v13 = vld [vmem:[%s268_s12 + $0x3] sm:$0x1]  ;;  %v836_v14 = vld [vmem:[%s268_s12 + $0x4] sm:$0x1] }
  0x10   : > { %312 = vmatpush.bf16.msra.mxu0 %v303_v6  ;;  %335 = vmatpush.bf16.msra.mxu1 %v326_v7  ;;  %v837_v15 = vld [vmem:[%s268_s12 + $0x5] sm:$0x1]  ;;  %v838_v16 = vld [vmem:[%s268_s12 + $0x6] sm:$0x1]  ;;  %v950_v26 = vld [vmem:[%s1104_s2] ss:$0 sm:$0xff] }
  0x11   : > { %355 = vmatpush.bf16.msra.mxu2 %v346_v8  ;;  %378 = vmatpush.bf16.msra.mxu3 %v326_v7  ;;  %v933_v20 = vld [vmem:[%s1105_s3 + $0x20] sm:$0xff]  ;;  %v930_v29 = vld [vmem:[%s1105_s3 + $0x8] sm:$0xff]  ;;  %vm778_vm4 = vcmask 253952  }
  0x12   : > { %v929_v35 = vld [vmem:[%s1105_s3] sm:$0xff] }
  0x13   : > { %842 = vmatmul.msk.bf16.vlgmr.msra.gmra.mxu0 %vm294_vm2, %v839_v9  ;;  %843 = vmatmul.msk.bf16.vlgmr.msra.gmra.mxu1 %vm294_vm2, %v273_v10  ;;  %v936_v10 = vld [vmem:[%s1107_s5 + $0x8] sm:$0xff] }
  0x14   : > { %844 = vmatmul.msk.bf16.vlgmr.msra.gmra.mxu2 %vm294_vm2, %v833_v11  ;;  %845 = vmatmul.msk.bf16.vlgmr.msra.gmra.mxu3 %vm294_vm2, %v834_v12  ;;  %v940_v12 = vld [vmem:[%s1107_s5 + $0x28] sm:$0xff] }
  0x15   : > { %427 = vmatpush.bf16.msrb.mxu2 %v326_v7  ;;  %440 = vmatpush.bf16.msrb.mxu3 %v303_v6 }
  0x16   : > { %407 = vmatpush.bf16.msrb.mxu1 %v346_v8  ;;  %391 = vmatpush.bf16.msrb.mxu0 %v303_v6 }
  0x19   : > { %489 = vmatpush.bf16.msra.mxu2 %v303_v6  ;;  %502 = vmatpush.bf16.msra.mxu3 %v346_v8 }
  0x1a   : > { %476 = vmatpush.bf16.msra.mxu1 %v326_v7  ;;  %456 = vmatpush.bf16.msra.mxu0 %v346_v8  ;;  %v938_v7 = vld [vmem:[%s1107_s5 + $0x18] sm:$0xff] }
  0x23   : > { %846 = vmatmul.msk.bf16.vlgmr.msrb.gmra.mxu0 %vm294_vm2, %v833_v11  ;;  %847 = vmatmul.msk.bf16.vlgmr.msrb.gmra.mxu1 %vm294_vm2, %v835_v13 }
  0x24   : > { %848 = vmatmul.msk.bf16.vlgmr.msrb.gmra.mxu2 %vm294_vm2, %v836_v14  ;;  %849 = vmatmul.msk.bf16.vlgmr.msrb.gmra.mxu3 %vm294_vm2, %v835_v13  ;;  %v935_v13 = vld [vmem:[%s1107_s5] sm:$0xff] }
  0x25   : > { %581 = vmatpush.bf16.msrb.mxu1 %v932_v17  ;;  %633 = vmatpush.bf16.msrb.mxu3 %v932_v17  ;;  %v939_v14 = vld [vmem:[%s1107_s5 + $0x20] sm:$0xff] }
  0x26   : > { %610 = vmatpush.bf16.msrb.mxu2 %v934_v19  ;;  %549 = vmatpush.bf16.msrb.mxu0 %v930_v29 }
  0x29   : > { %582 = vmatpush.bf16.msrb.mxu1 %v931_v18  ;;  %634 = vmatpush.bf16.msrb.mxu3 %v931_v18 }
  0x2a   : > { %611 = vmatpush.bf16.msrb.mxu2 %v933_v20  ;;  %550 = vmatpush.bf16.msrb.mxu0 %v929_v35 }
  0x33   : > { %850 = vmatmul.msk.bf16.vlgmr.msra.gmra.mxu0 %vm294_vm2, %v837_v15  ;;  %851 = vmatmul.msk.bf16.vlgmr.msra.gmra.mxu1 %vm294_vm2, %v838_v16 }
  0x34   : > { %852 = vmatmul.msk.bf16.vlgmr.msra.gmra.mxu2 %vm294_vm2, %v837_v15  ;;  %853 = vmatmul.msk.bf16.vlgmr.msra.gmra.mxu3 %vm294_vm2, %v839_v9  ;;  %v937_v9 = vld [vmem:[%s1107_s5 + $0x10] sm:$0xff] }
  0x35   : > { %659 = vmatpush.bf16.msra.mxu1 %v934_v19  ;;  %646 = vmatpush.bf16.msra.mxu0 %v930_v29 }
  0x36   : > { %738 = vmatpush.bf16.msra.mxu3 %v938_v7  ;;  %706 = vmatpush.bf16.msra.mxu2 %v936_v10 }
  0x39   : > { %660 = vmatpush.bf16.msra.mxu1 %v933_v20  ;;  %647 = vmatpush.bf16.msra.mxu0 %v929_v35 }
  0x3a   : > { %739 = vmatpush.bf16.msra.mxu3 %v937_v9  ;;  %707 = vmatpush.bf16.msra.mxu2 %v935_v13 }
  0x90   : > { %v314_v21 = vpop.f32.mrf.mxu0  ;;  %v337_v22 = vpop.f32.mrf.mxu1 }
  0x91   : > { %v319_v23 = vrot.slane %v314_v21, 7 }
  0x93   : > { %v321_v24 = vsel %vm298_vm0, 0.0, %v319_v23 }
  0x94   : > { %v341_v25 = vadd.f32 %v337_v22, %v321_v24  ;;  %v951_v22 = vld [vmem:[%s1106_s4] ss:$0 sm:$0xff] }
  0x97   : > { %v357_v27 = vpop.f32.mrf.mxu2  ;;  %v380_v28 = vpop.f32.mrf.mxu3 }
  0x98   : > { %v361_v30 = vadd.f32 %v357_v27, %v341_v25  ;;  %v316_v31 = vpop.f32.mrf.mxu0  ;;  %v339_v32 = vpop.f32.mrf.mxu1 }
  0x9a   : > { %v365_v33 = vadd.f32 %v950_v26, %v361_v30 }
  0x9c   : > { %v366_v34 = vmax.f32 %v365_v33, 0.0 }
  0x9e   : > { %v367_v36 = vpack.c.bf16 %v366_v34, %v366_v34 }
  0x9f   : > { %v359_v37 = vpop.f32.mrf.mxu2  ;;  %v382_v38 = vpop.f32.mrf.mxu3 }
  0xa0   : > { %879 = vmatmul.msk.bf16.vlgmr.msrb.gmra.mxu1 %vm539_vm3, %v367_v36  ;;  %v393_v39 = vpop.f32.mrf.mxu0  ;;  %v409_v40 = vpop.f32.mrf.mxu1 }
  0xa1   : > { %v394_v41 = vadd.f32 %v393_v39, %v380_v28 }
  0xa3   : > { %v413_v42 = vadd.f32 %v409_v40, %v394_v41 }
  0xa5   : > { %v414_v43 = vadd.f32 %v950_v26, %v413_v42 }
  0xa7   : > { %v415_v44 = vmax.f32 %v414_v43, 0.0  ;;  %v429_v45 = vpop.f32.mrf.mxu2  ;;  %v442_v46 = vpop.f32.mrf.mxu3 }
  0xa8   : > { %v395_v47 = vpop.f32.mrf.mxu0  ;;  %v411_v48 = vpop.f32.mrf.mxu1  ;;  %v443_v50 = vadd.f32 %v442_v46, %v429_v45  ;;  %v952_v45 = vld [vmem:[%s1108_s6] ss:$0 sm:$0xff] }
  0xa9   : > { %v416_v49 = vpack.c.bf16 %v415_v44, %v415_v44 }
  0xab   : > { %888 = vmatmul.msk.bf16.vlgmr.msrb.gmra.mxu2 %vm539_vm3, %v416_v49 }
  0xaf   : > { %v431_v51 = vpop.f32.mrf.mxu2  ;;  %v444_v52 = vpop.f32.mrf.mxu3 }
  0xb0   : > { %v458_v53 = vpop.f32.mrf.mxu0  ;;  %v478_v54 = vpop.f32.mrf.mxu1 }
  0xb1   : > { %v462_v55 = vadd.f32 %v458_v53, %v443_v50 }
  0xb3   : > { %v463_v56 = vadd.f32 %v950_v26, %v462_v55 }
  0xb5   : > { %v464_v57 = vmax.f32 %v463_v56, 0.0 }
  0xb7   : > { %v465_v58 = vpack.c.bf16 %v464_v57, %v464_v57  ;;  %v491_v59 = vpop.f32.mrf.mxu2  ;;  %v504_v60 = vpop.f32.mrf.mxu3 }
  0xb8   : > { %v492_v61 = vadd.f32 %v491_v59, %v478_v54  ;;  %v480_v62 = vpop.f32.mrf.mxu1  ;;  %v460_v63 = vpop.f32.mrf.mxu0 }
  0xb9   : > { %889 = vmatmul.msk.bf16.vlgmr.msrb.gmra.mxu3 %vm539_vm3, %v465_v58 }
  0xba   : > { %v508_v0 = vadd.f32 %v504_v60, %v492_v61 }
  0xbc   : > { %v509_v1 = vadd.f32 %v950_v26, %v508_v0 }
  0xbe   : > { %v510_v2 = vmax.f32 %v509_v1, 0.0 }
  0xbf   : > { %v493_v3 = vpop.f32.mrf.mxu2  ;;  %v506_v4 = vpop.f32.mrf.mxu3 }
  0xc0   : > { %v511_v5 = vpack.c.bf16 %v510_v2, %v510_v2 }
  0xc2   : > { %870 = vmatmul.msk.bf16.vlgmr.msrb.gmra.mxu0 %vm539_vm3, %v511_v5  ;;  %891 = vmatmul.msk.bf16.vlgmr.msra.gmra.mxu1 %vm539_vm3, %v511_v5 }
  0xc3   : > { %764 = vmatpush.bf16.msrb.mxu0 %v940_v12 }
  0xc7   : > { %765 = vmatpush.bf16.msrb.mxu0 %v939_v14 }
  0xd2   : > { %890 = vmatmul.msk.bf16.vlgmr.msra.gmra.mxu0 %vm539_vm3, %v416_v49 }
 0x11d   : > { %v584_v6 = vpop.f32.mrf.mxu1 }
 0x125   : > { %v586_v8 = vpop.f32.mrf.mxu1 }
 0x12e   : > { %v613_v11 = vpop.f32.mrf.mxu2 }
 0x136   : > { %v615_v15 = vpop.f32.mrf.mxu2 }
 0x13c   : > { %v636_v16 = vpop.f32.mrf.mxu3 }
 0x13f   : > { %v552_v17 = vpop.f32.mrf.mxu0  ;;  %v662_v18 = vpop.f32.mrf.mxu1 }
 0x140   : > { %v557_v19 = vrot.slane %v552_v17, 7 }
 0x142   : > { %v559_v20 = vsel %vm298_vm0, 0.0, %v557_v19 }
 0x143   : > { %v588_v21 = vadd.f32 %v584_v6, %v559_v20 }
 0x144   : > { %v638_v23 = vpop.f32.mrf.mxu3 }
 0x145   : > { %v617_v24 = vadd.f32 %v613_v11, %v588_v21 }
 0x147   : > { %v621_v25 = vadd.f32 %v951_v22, %v617_v24  ;;  %v554_v26 = vpop.f32.mrf.mxu0  ;;  %v664_v27 = vpop.f32.mrf.mxu1 }
 0x149   : > { %v622_v28 = vmax.f32 %v621_v25, 0.0 }
 0x14b   : > { %v623_v29 = vpack.c.bf16 %v622_v28, %v622_v28 }
 0x14d   : > { %917 = vmatmul.msk.bf16.vlgmr.msra.gmra.mxu3 %vm539_vm3, %v623_v29 }
 0x14f   : > { %v649_v30 = vpop.f32.mrf.mxu0 }
 0x150   : > { %v650_v31 = vadd.f32 %v649_v30, %v636_v16 }
 0x152   : > { %v666_v32 = vadd.f32 %v662_v18, %v650_v31 }
 0x154   : > { %v667_v33 = vadd.f32 %v951_v22, %v666_v32 }
 0x156   : > { %v668_v34 = vmax.f32 %v667_v33, 0.0 }
 0x157   : > { %v651_v35 = vpop.f32.mrf.mxu0 }
 0x158   : > { %v669_v36 = vpack.c.bf16 %v668_v34, %v668_v34 }
 0x15a   : > { %908 = vmatmul.msk.bf16.vlgmr.msra.gmra.mxu2 %vm539_vm3, %v669_v36  ;;  %926 = vmatmul.msk.bf16.vlgmr.msrb.gmra.mxu0 %vm539_vm3, %v669_v36 }
 0x1d0   : > { %v741_v37 = vpop.f32.mrf.mxu3 }
 0x1d7   : > { %v767_v38 = vpop.f32.mrf.mxu0 }
 0x1d8   : > { %v743_v39 = vpop.f32.mrf.mxu3 }
 0x1dd   : > { %v709_v40 = vpop.f32.mrf.mxu2 }
 0x1de   : > { %v714_v41 = vrot.slane %v709_v40, 7 }
 0x1df   : > { %v769_v42 = vpop.f32.mrf.mxu0 }
 0x1e0   : > { %v716_v43 = vsel %vm298_vm0, 0.0, %v714_v41 }
 0x1e1   : > { %v745_v44 = vadd.f32 %v741_v37, %v716_v43 }
 0x1e3   : > { %v771_v46 = vadd.f32 %v767_v38, %v745_v44 }
 0x1e5   : > { %v775_v47 = vadd.f32 %v952_v45, %v771_v46  ;;  %v711_v48 = vpop.f32.mrf.mxu2 }
 0x1e7   : > { %v776_v49 = vmax.f32 %v775_v47, 0.0 }
 0x1e9   : > { %v777_v50 = vpack.c.bf16 %v776_v49, %v776_v49 }
 0x1eb   : > { %779 = vst.msk [vmem:[%s271_s26] sm:$0x1] %vm778_vm4, %v777_v50 }
 0x1ec PF: > { %s17_s24 = sadd.s32 1, %s959_s24  }
 0x1ed   : > { %p14_p4 = scmp.ge.s32.totalorder %s17_s24, 4  }
 0x1ef   :  { %16 = sbr.rel (!%p14_p4) target bundleno = 1 (0x1), region = 91 }

</bundles_post_ra>
